<compile_context>
chip_gen: v7x
topology: tpu7x:2x2x1
jax: 0.10.0
libtpu: 0.0.40
codegen_flags: <defaults>
</compile_context>

<pallas_src>
import functools

import jax
import jax.numpy as jnp
from jax import lax
from jax.experimental import pallas as pl
from jax.experimental.pallas import tpu as pltpu


def _softplus(x):
    # matches torch.nn.Softplus(beta=1, threshold=20)
    return jnp.where(x > 20.0, x, jnp.log1p(jnp.exp(jnp.minimum(x, 20.0))))


def decoder_kernel(x_ref, w_ref, b_ref, h0_ref, c0_ref,
                   pred_ref, h_out_ref, c_out_ref):
    """Multi-layer LSTM recurrence + Softplus for one batch block.

    x_ref     : (Bb, T, H)    input sequence block
    w_ref     : (L, 2H, 4H)   per-layer fused weights; rows [0:H] = W_ih^T,
                              rows [H:2H] = W_hh^T (gate order i, f, g, o)
    b_ref     : (L, 1, 4H)    combined bias (b_ih + b_hh)
    h0_ref    : (Bb, L, H)    initial hidden state block
    c0_ref    : (Bb, L, H)    initial cell state block
    pred_ref  : (Bb, 1, H)    softplus(output[:, -1, :])
    h_out_ref : (Bb, L, H)    final hidden states (aliased onto h0 buffer)
    c_out_ref : (Bb, L, H)    final cell states  (aliased onto c0 buffer)
    """
    Bb, T, H = x_ref.shape
    L = h0_ref.shape[1]

    # ---- Per-layer weights / bias: loaded and statically sliced once,
    #      outside the recurrence.
    wih, whh, bias = [], [], []
    for l in range(L):
        wl = w_ref[l]                     # (2H, 4H)
        wih.append(wl[0:H, :])            # (H, 4H)  = W_ih^T
        whh.append(wl[H:2 * H, :])        # (H, 4H)  = W_hh^T
        bias.append(b_ref[l])             # (1, 4H)

    # ---- Hoisted layer-0 input projection for ALL timesteps.  One-time
    #      leading-dim transpose makes it time-major so the per-step read is
    #      a contiguous static slice (no strided middle-dim slicing inside
    #      the latency-bound loop).
    x_tb = jnp.swapaxes(x_ref[...], 0, 1).reshape(T * Bb, H)   # row = t*Bb + b
    preact0 = jnp.dot(x_tb, wih[0],
                      preferred_element_type=jnp.float32) + bias[0]  # (T*Bb,4H)

    h0 = h0_ref[...]
    c0 = c0_ref[...]
    h = [h0[:, l, :] for l in range(L)]    # each (Bb, H)
    c = [c0[:, l, :] for l in range(L)]

    def lstm_cell(gates, c_prev):
        # Full-width activations: one sigmoid + one tanh over the whole
        # (Bb, 4H) vreg, then cheap static lane slices of the results.
        sig = jax.nn.sigmoid(gates)
        tah = jnp.tanh(gates)
        i_g = sig[:, 0 * H:1 * H]
        f_g = sig[:, 1 * H:2 * H]
        g_g = tah[:, 2 * H:3 * H]
        o_g = sig[:, 3 * H:4 * H]
        c_new = f_g * c_prev + i_g * g_g
        h_new = o_g * jnp.tanh(c_new)
        return h_new, c_new

    # TODO(synk): keep each layer's recurrent RHS resident in the MXU across
    # the unrolled T loop via pltpu.matmul_push_rhs / matmul_acc_lhs /
    # matmul_pop; skipped here to keep lowering risk at zero on tiny
    # (32..64, 128) RHS shapes.  bf16 matmul operands likewise left out to
    # protect the 1e-4 tolerance.
    for t in range(T):                     # fully unrolled (T, L are static)
        # Layer 0: only the recurrent matmul sits on the serial chain.
        gates0 = preact0[t * Bb:(t + 1) * Bb, :] + jnp.dot(
            h[0], whh[0], preferred_element_type=jnp.float32)
        h[0], c[0] = lstm_cell(gates0, c[0])
        # Layers >= 1: two small matmuls, NO lane-axis concat.  The
        # h[l] @ W_hh term only depends on the previous timestep, so the
        # scheduler can issue it early and overlap the layer-0 cell.
        for l in range(1, L):
            gates = (jnp.dot(h[l - 1], wih[l],
                             preferred_element_type=jnp.float32)
                     + jnp.dot(h[l], whh[l],
                               preferred_element_type=jnp.float32)
                     + bias[l])
            h[l], c[l] = lstm_cell(gates, c[l])

    # ---- Outputs: one full-block store each.
    h_out_ref[...] = jnp.stack(h, axis=1)          # (Bb, L, H)
    c_out_ref[...] = jnp.stack(c, axis=1)
    # output[:, -1, :] of the top layer == final hidden of the last layer.
    pred_ref[...] = _softplus(h[L - 1]).reshape(Bb, 1, H)


def prepare_decoder_params(w_ih, w_hh, b_ih, b_hh):
    """One-time weight preparation (hoisted out of the per-call jitted path).

    w_ih, w_hh: (L, 4H, H); b_ih, b_hh: (L, 4H).
    Returns:
      wfused: (L, 2H, 4H) with rows [0:H] = W_ih^T, rows [H:2H] = W_hh^T
      bias  : (L, 1, 4H)  = b_ih + b_hh
    Note: the Decoder has input_size == hidden_size; this fused layout relies
    on it (as does the module itself).
    """
    wfused = jnp.concatenate(
        [jnp.transpose(w_ih, (0, 2, 1)), jnp.transpose(w_hh, (0, 2, 1))],
        axis=1).astype(jnp.float32)                          # (L, 2H, 4H)
    bias = (b_ih + b_hh).astype(jnp.float32)[:, None, :]     # (L, 1, 4H)
    return wfused, bias


def _num_batch_blocks(batch_size):
    """Batch rows are independent LSTM chains: shard them across the two
    TensorCores on v7x; stay single-shot on single-TC chips (v5e/v6e)."""
    try:
        kind = jax.devices()[0].device_kind.lower()
    except Exception:
        return 1
    if "v7" in kind and batch_size % 2 == 0:
        return 2
    return 1


@functools.partial(jax.jit, static_argnames=("num_batch_blocks",))
def decoder_forward(input_seq, h_t, c_t, wfused, bias, num_batch_blocks=1):
    """input_seq: (B, T, H); h_t, c_t: (L, B, H);
    wfused/bias from prepare_decoder_params.
    Returns (pred (B, H), h (L, B, H), c (L, B, H))."""
    B, T, H = input_seq.shape
    L = h_t.shape[0]
    nb = num_batch_blocks
    assert B % nb == 0
    Bb = B // nb

    x = input_seq.astype(jnp.float32)                          # (B, T, H)
    h0 = jnp.transpose(h_t, (1, 0, 2)).astype(jnp.float32)     # (B, L, H)
    c0 = jnp.transpose(c_t, (1, 0, 2)).astype(jnp.float32)     # (B, L, H)

    pred, h_out, c_out = pl.pallas_call(
        decoder_kernel,
        grid=(nb,),
        in_specs=[
            pl.BlockSpec((Bb, T, H), lambda i: (i, 0, 0)),           # x
            pl.BlockSpec((L, 2 * H, 4 * H), lambda i: (0, 0, 0)),    # wfused
            pl.BlockSpec((L, 1, 4 * H), lambda i: (0, 0, 0)),        # bias
            pl.BlockSpec((Bb, L, H), lambda i: (i, 0, 0)),           # h0
            pl.BlockSpec((Bb, L, H), lambda i: (i, 0, 0)),           # c0
        ],
        out_specs=(
            pl.BlockSpec((Bb, 1, H), lambda i: (i, 0, 0)),           # pred
            pl.BlockSpec((Bb, L, H), lambda i: (i, 0, 0)),           # h_out
            pl.BlockSpec((Bb, L, H), lambda i: (i, 0, 0)),           # c_out
        ),
        out_shape=(
            jax.ShapeDtypeStruct((B, 1, H), jnp.float32),
            jax.ShapeDtypeStruct((B, L, H), jnp.float32),
            jax.ShapeDtypeStruct((B, L, H), jnp.float32),
        ),
        # Reuse the fresh h0/c0 buffers for the state outputs.
        input_output_aliases={3: 1, 4: 2},
        compiler_params=pltpu.CompilerParams(
            dimension_semantics=("parallel",)),
    )(x, wfused, bias, h0, c0)

    return (pred[:, 0, :],
            jnp.transpose(h_out, (1, 0, 2)),
            jnp.transpose(c_out, (1, 0, 2)))


def lstm_reference(input_seq, h_t, c_t, w_ih, w_hh, b_ih, b_hh):
    """Pure-JAX reference of torch.nn.LSTM(batch_first) + Softplus."""
    L = h_t.shape[0]
    H = h_t.shape[2]
    seq = input_seq
    h_list, c_list = [], []
    for l in range(L):
        def step(carry, x_t, l=l):
            h, c = carry
            gates = x_t @ w_ih[l].T + h @ w_hh[l].T + b_ih[l] + b_hh[l]
            i = jax.nn.sigmoid(gates[:, 0 * H:1 * H])
            f = jax.nn.sigmoid(gates[:, 1 * H:2 * H])
            g = jnp.tanh(gates[:, 2 * H:3 * H])
            o = jax.nn.sigmoid(gates[:, 3 * H:4 * H])
            c_new = f * c + i * g
            h_new = o * jnp.tanh(c_new)
            return (h_new, c_new), h_new

        (h_f, c_f), outs = lax.scan(step, (h_t[l], c_t[l]),
                                    jnp.transpose(seq, (1, 0, 2)))
        seq = jnp.transpose(outs, (1, 0, 2))
        h_list.append(h_f)
        c_list.append(c_f)
    pred = _softplus(seq[:, -1, :])
    return pred, jnp.stack(h_list), jnp.stack(c_list)


if __name__ == "__main__":
    # Shapes implied by the module: hidden_size=32, num_layers=2,
    # batch_size=2, seq_len=8.  input_size == hidden_size for this Decoder.
    B, T, H, L = 2, 8, 32, 2

    key = jax.random.PRNGKey(0)
    k = 1.0 / jnp.sqrt(jnp.float32(H))  # PyTorch LSTM default uniform bound
    keys = jax.random.split(key, 7)

    input_seq = jax.random.normal(keys[0], (B, T, H), dtype=jnp.float32)
    h_t = jax.random.normal(keys[1], (L, B, H), dtype=jnp.float32)
    c_t = jax.random.normal(keys[2], (L, B, H), dtype=jnp.float32)

    w_ih = jax.random.uniform(keys[3], (L, 4 * H, H), minval=-k, maxval=k)
    w_hh = jax.random.uniform(keys[4], (L, 4 * H, H), minval=-k, maxval=k)
    b_ih = jax.random.uniform(keys[5], (L, 4 * H), minval=-k, maxval=k)
    b_hh = jax.random.uniform(keys[6], (L, 4 * H), minval=-k, maxval=k)

    # One-time weight prep (module init), outside the per-call path.
    wfused, bias = prepare_decoder_params(w_ih, w_hh, b_ih, b_hh)
    wfused, bias = jax.block_until_ready((wfused, bias))

    nb = _num_batch_blocks(B)   # 2 on v7x (2 TensorCores), else 1
    pred, h_out, c_out = decoder_forward(input_seq, h_t, c_t, wfused, bias,
                                         num_batch_blocks=nb)
    jax.block_until_ready((pred, h_out, c_out))

    pred_r, h_r, c_r = lstm_reference(input_seq, h_t, c_t,
                                      w_ih, w_hh, b_ih, b_hh)
    assert jnp.allclose(pred, pred_r, atol=1e-4, rtol=1e-4)
    assert jnp.allclose(h_out, h_r, atol=1e-4, rtol=1e-4)
    assert jnp.allclose(c_out, c_r, atol=1e-4, rtol=1e-4)

    print("KERNEL_OK")
</pallas_src>

<mosaic_0001>
module attributes {stable_mosaic.version = 11 : i64} {
  func.func @decoder_kernel(%arg0: i32, %arg1: memref<2x8x32xf32, #tpu.memory_space<vmem>>, %arg2: memref<2x64x128xf32, #tpu.memory_space<vmem>>, %arg3: memref<2x1x128xf32, #tpu.memory_space<vmem>>, %arg4: memref<2x2x32xf32, #tpu.memory_space<vmem>>, %arg5: memref<2x2x32xf32, #tpu.memory_space<vmem>>, %arg6: memref<2x1x32xf32, #tpu.memory_space<vmem>>, %arg7: memref<2x2x32xf32, #tpu.memory_space<vmem>>, %arg8: memref<2x2x32xf32, #tpu.memory_space<vmem>>) attributes {dimension_semantics = [#tpu.dimension_semantics<parallel>], iteration_bounds = array<i64: 1>, scalar_prefetch = 0 : i64, scratch_operands = 0 : i64, tpu.core_type = #tpu.core_type<tc>, window_params = [{transform_indices = @transform_0, window_bounds = array<i64: 2, 8, 32>}, {pipeline_mode = #tpu.pipeline_mode<synchronous>, transform_indices = @transform_1, window_bounds = array<i64: 2, 64, 128>}, {pipeline_mode = #tpu.pipeline_mode<synchronous>, transform_indices = @transform_2, window_bounds = array<i64: 2, 1, 128>}, {transform_indices = @transform_3, window_bounds = array<i64: 2, 2, 32>}, {transform_indices = @transform_4, window_bounds = array<i64: 2, 2, 32>}, {transform_indices = @transform_5, window_bounds = array<i64: 2, 1, 32>}, {transform_indices = @transform_6, window_bounds = array<i64: 2, 2, 32>}, {transform_indices = @transform_7, window_bounds = array<i64: 2, 2, 32>}]} {
    %c0 = arith.constant 0 : index
    %c0_0 = arith.constant 0 : index
    %c0_1 = arith.constant 0 : index
    %0 = vector.load %arg2[%c0, %c0_0, %c0_1] : memref<2x64x128xf32, #tpu.memory_space<vmem>>, vector<1x64x128xf32>
    %1 = vector.shape_cast %0 : vector<1x64x128xf32> to vector<64x128xf32>
    %2 = vector.extract_strided_slice %1 {offsets = [0, 0], sizes = [32, 128], strides = [1, 1]} : vector<64x128xf32> to vector<32x128xf32>
    %3 = vector.extract_strided_slice %1 {offsets = [32, 0], sizes = [32, 128], strides = [1, 1]} : vector<64x128xf32> to vector<32x128xf32>
    %c0_2 = arith.constant 0 : index
    %c0_3 = arith.constant 0 : index
    %c0_4 = arith.constant 0 : index
    %4 = vector.load %arg3[%c0_2, %c0_3, %c0_4] : memref<2x1x128xf32, #tpu.memory_space<vmem>>, vector<1x1x128xf32>
    %5 = vector.shape_cast %4 : vector<1x1x128xf32> to vector<1x128xf32>
    %c1 = arith.constant 1 : index
    %c0_5 = arith.constant 0 : index
    %c0_6 = arith.constant 0 : index
    %6 = vector.load %arg2[%c1, %c0_5, %c0_6] : memref<2x64x128xf32, #tpu.memory_space<vmem>>, vector<1x64x128xf32>
    %7 = vector.shape_cast %6 : vector<1x64x128xf32> to vector<64x128xf32>
    %8 = vector.extract_strided_slice %7 {offsets = [0, 0], sizes = [32, 128], strides = [1, 1]} : vector<64x128xf32> to vector<32x128xf32>
    %9 = vector.extract_strided_slice %7 {offsets = [32, 0], sizes = [32, 128], strides = [1, 1]} : vector<64x128xf32> to vector<32x128xf32>
    %c1_7 = arith.constant 1 : index
    %c0_8 = arith.constant 0 : index
    %c0_9 = arith.constant 0 : index
    %10 = vector.load %arg3[%c1_7, %c0_8, %c0_9] : memref<2x1x128xf32, #tpu.memory_space<vmem>>, vector<1x1x128xf32>
    %11 = vector.shape_cast %10 : vector<1x1x128xf32> to vector<1x128xf32>
    %c0_10 = arith.constant 0 : index
    %c0_11 = arith.constant 0 : index
    %c0_12 = arith.constant 0 : index
    %12 = vector.load %arg1[%c0_10, %c0_11, %c0_12] : memref<2x8x32xf32, #tpu.memory_space<vmem>>, vector<2x8x32xf32>
    %13 = tpu.transpose %12, [1, 0, 2] : vector<2x8x32xf32> -> vector<8x2x32xf32>
    %14 = vector.shape_cast %13 : vector<8x2x32xf32> to vector<16x32xf32>
    %cst = arith.constant dense<0.000000e+00> : vector<16x128xf32>
    %15 = tpu.matmul %14, %2, %cst {dimension_numbers = #tpu.dot_dimension_numbers<[1], [0], [0], [1], [0, 0, 1, 1], [], []>} : vector<16x32xf32>, vector<32x128xf32>, vector<16x128xf32> -> vector<16x128xf32>
    %16 = vector.broadcast %5 : vector<1x128xf32> to vector<16x128xf32>
    %17 = arith.addf %15, %16 : vector<16x128xf32>
    %c0_13 = arith.constant 0 : index
    %c0_14 = arith.constant 0 : index
    %c0_15 = arith.constant 0 : index
    %18 = vector.load %arg4[%c0_13, %c0_14, %c0_15] : memref<2x2x32xf32, #tpu.memory_space<vmem>>, vector<2x2x32xf32>
    %c0_16 = arith.constant 0 : index
    %c0_17 = arith.constant 0 : index
    %c0_18 = arith.constant 0 : index
    %19 = vector.load %arg5[%c0_16, %c0_17, %c0_18] : memref<2x2x32xf32, #tpu.memory_space<vmem>>, vector<2x2x32xf32>
    %20 = vector.extract_strided_slice %18 {offsets = [0, 0, 0], sizes = [2, 1, 32], strides = [1, 1, 1]} : vector<2x2x32xf32> to vector<2x1x32xf32>
    %21 = vector.shape_cast %20 : vector<2x1x32xf32> to vector<2x32xf32>
    %22 = vector.extract_strided_slice %18 {offsets = [0, 1, 0], sizes = [2, 1, 32], strides = [1, 1, 1]} : vector<2x2x32xf32> to vector<2x1x32xf32>
    %23 = vector.shape_cast %22 : vector<2x1x32xf32> to vector<2x32xf32>
    %24 = vector.extract_strided_slice %19 {offsets = [0, 0, 0], sizes = [2, 1, 32], strides = [1, 1, 1]} : vector<2x2x32xf32> to vector<2x1x32xf32>
    %25 = vector.shape_cast %24 : vector<2x1x32xf32> to vector<2x32xf32>
    %26 = vector.extract_strided_slice %19 {offsets = [0, 1, 0], sizes = [2, 1, 32], strides = [1, 1, 1]} : vector<2x2x32xf32> to vector<2x1x32xf32>
    %27 = vector.shape_cast %26 : vector<2x1x32xf32> to vector<2x32xf32>
    %28 = vector.extract_strided_slice %17 {offsets = [0, 0], sizes = [2, 128], strides = [1, 1]} : vector<16x128xf32> to vector<2x128xf32>
    %cst_19 = arith.constant dense<0.000000e+00> : vector<2x128xf32>
    %29 = tpu.matmul %21, %3, %cst_19 {dimension_numbers = #tpu.dot_dimension_numbers<[1], [0], [0], [1], [0, 0, 1, 1], [], []>} : vector<2x32xf32>, vector<32x128xf32>, vector<2x128xf32> -> vector<2x128xf32>
    %30 = arith.addf %28, %29 : vector<2x128xf32>
    %31 = arith.negf %30 : vector<2x128xf32>
    %32 = math.exp %31 : vector<2x128xf32>
    %cst_20 = arith.constant 1.000000e+00 : f32
    %33 = vector.broadcast %cst_20 : f32 to vector<2x128xf32>
    %34 = arith.addf %33, %32 : vector<2x128xf32>
    %35 = arith.divf %33, %34 : vector<2x128xf32>
    %36 = math.tanh %30 : vector<2x128xf32>
    %37 = vector.extract_strided_slice %35 {offsets = [0, 0], sizes = [2, 32], strides = [1, 1]} : vector<2x128xf32> to vector<2x32xf32>
    %38 = vector.extract_strided_slice %35 {offsets = [0, 32], sizes = [2, 32], strides = [1, 1]} : vector<2x128xf32> to vector<2x32xf32>
    %39 = vector.extract_strided_slice %36 {offsets = [0, 64], sizes = [2, 32], strides = [1, 1]} : vector<2x128xf32> to vector<2x32xf32>
    %40 = vector.extract_strided_slice %35 {offsets = [0, 96], sizes = [2, 32], strides = [1, 1]} : vector<2x128xf32> to vector<2x32xf32>
    %41 = arith.mulf %38, %25 : vector<2x32xf32>
    %42 = arith.mulf %37, %39 : vector<2x32xf32>
    %43 = arith.addf %41, %42 : vector<2x32xf32>
    %44 = math.tanh %43 : vector<2x32xf32>
    %45 = arith.mulf %40, %44 : vector<2x32xf32>
    %cst_21 = arith.constant dense<0.000000e+00> : vector<2x128xf32>
    %46 = tpu.matmul %45, %8, %cst_21 {dimension_numbers = #tpu.dot_dimension_numbers<[1], [0], [0], [1], [0, 0, 1, 1], [], []>} : vector<2x32xf32>, vector<32x128xf32>, vector<2x128xf32> -> vector<2x128xf32>
    %cst_22 = arith.constant dense<0.000000e+00> : vector<2x128xf32>
    %47 = tpu.matmul %23, %9, %cst_22 {dimension_numbers = #tpu.dot_dimension_numbers<[1], [0], [0], [1], [0, 0, 1, 1], [], []>} : vector<2x32xf32>, vector<32x128xf32>, vector<2x128xf32> -> vector<2x128xf32>
    %48 = arith.addf %46, %47 : vector<2x128xf32>
    %49 = vector.broadcast %11 : vector<1x128xf32> to vector<2x128xf32>
    %50 = arith.addf %48, %49 : vector<2x128xf32>
    %51 = arith.negf %50 : vector<2x128xf32>
    %52 = math.exp %51 : vector<2x128xf32>
    %cst_23 = arith.constant 1.000000e+00 : f32
    %53 = vector.broadcast %cst_23 : f32 to vector<2x128xf32>
    %54 = arith.addf %53, %52 : vector<2x128xf32>
    %55 = arith.divf %53, %54 : vector<2x128xf32>
    %56 = math.tanh %50 : vector<2x128xf32>
    %57 = vector.extract_strided_slice %55 {offsets = [0, 0], sizes = [2, 32], strides = [1, 1]} : vector<2x128xf32> to vector<2x32xf32>
    %58 = vector.extract_strided_slice %55 {offsets = [0, 32], sizes = [2, 32], strides = [1, 1]} : vector<2x128xf32> to vector<2x32xf32>
    %59 = vector.extract_strided_slice %56 {offsets = [0, 64], sizes = [2, 32], strides = [1, 1]} : vector<2x128xf32> to vector<2x32xf32>
    %60 = vector.extract_strided_slice %55 {offsets = [0, 96], sizes = [2, 32], strides = [1, 1]} : vector<2x128xf32> to vector<2x32xf32>
    %61 = arith.mulf %58, %27 : vector<2x32xf32>
    %62 = arith.mulf %57, %59 : vector<2x32xf32>
    %63 = arith.addf %61, %62 : vector<2x32xf32>
    %64 = math.tanh %63 : vector<2x32xf32>
    %65 = arith.mulf %60, %64 : vector<2x32xf32>
    %66 = vector.extract_strided_slice %17 {offsets = [2, 0], sizes = [2, 128], strides = [1, 1]} : vector<16x128xf32> to vector<2x128xf32>
    %cst_24 = arith.constant dense<0.000000e+00> : vector<2x128xf32>
    %67 = tpu.matmul %45, %3, %cst_24 {dimension_numbers = #tpu.dot_dimension_numbers<[1], [0], [0], [1], [0, 0, 1, 1], [], []>} : vector<2x32xf32>, vector<32x128xf32>, vector<2x128xf32> -> vector<2x128xf32>
    %68 = arith.addf %66, %67 : vector<2x128xf32>
    %69 = arith.negf %68 : vector<2x128xf32>
    %70 = math.exp %69 : vector<2x128xf32>
    %cst_25 = arith.constant 1.000000e+00 : f32
    %71 = vector.broadcast %cst_25 : f32 to vector<2x128xf32>
    %72 = arith.addf %71, %70 : vector<2x128xf32>
    %73 = arith.divf %71, %72 : vector<2x128xf32>
    %74 = math.tanh %68 : vector<2x128xf32>
    %75 = vector.extract_strided_slice %73 {offsets = [0, 0], sizes = [2, 32], strides = [1, 1]} : vector<2x128xf32> to vector<2x32xf32>
    %76 = vector.extract_strided_slice %73 {offsets = [0, 32], sizes = [2, 32], strides = [1, 1]} : vector<2x128xf32> to vector<2x32xf32>
    %77 = vector.extract_strided_slice %74 {offsets = [0, 64], sizes = [2, 32], strides = [1, 1]} : vector<2x128xf32> to vector<2x32xf32>
    %78 = vector.extract_strided_slice %73 {offsets = [0, 96], sizes = [2, 32], strides = [1, 1]} : vector<2x128xf32> to vector<2x32xf32>
    %79 = arith.mulf %76, %43 : vector<2x32xf32>
    %80 = arith.mulf %75, %77 : vector<2x32xf32>
    %81 = arith.addf %79, %80 : vector<2x32xf32>
    %82 = math.tanh %81 : vector<2x32xf32>
    %83 = arith.mulf %78, %82 : vector<2x32xf32>
    %cst_26 = arith.constant dense<0.000000e+00> : vector<2x128xf32>
    %84 = tpu.matmul %83, %8, %cst_26 {dimension_numbers = #tpu.dot_dimension_numbers<[1], [0], [0], [1], [0, 0, 1, 1], [], []>} : vector<2x32xf32>, vector<32x128xf32>, vector<2x128xf32> -> vector<2x128xf32>
    %cst_27 = arith.constant dense<0.000000e+00> : vector<2x128xf32>
    %85 = tpu.matmul %65, %9, %cst_27 {dimension_numbers = #tpu.dot_dimension_numbers<[1], [0], [0], [1], [0, 0, 1, 1], [], []>} : vector<2x32xf32>, vector<32x128xf32>, vector<2x128xf32> -> vector<2x128xf32>
    %86 = arith.addf %84, %85 : vector<2x128xf32>
    %87 = vector.broadcast %11 : vector<1x128xf32> to vector<2x128xf32>
    %88 = arith.addf %86, %87 : vector<2x128xf32>
    %89 = arith.negf %88 : vector<2x128xf32>
    %90 = math.exp %89 : vector<2x128xf32>
    %cst_28 = arith.constant 1.000000e+00 : f32
    %91 = vector.broadcast %cst_28 : f32 to vector<2x128xf32>
    %92 = arith.addf %91, %90 : vector<2x128xf32>
    %93 = arith.divf %91, %92 : vector<2x128xf32>
    %94 = math.tanh %88 : vector<2x128xf32>
    %95 = vector.extract_strided_slice %93 {offsets = [0, 0], sizes = [2, 32], strides = [1, 1]} : vector<2x128xf32> to vector<2x32xf32>
    %96 = vector.extract_strided_slice %93 {offsets = [0, 32], sizes = [2, 32], strides = [1, 1]} : vector<2x128xf32> to vector<2x32xf32>
    %97 = vector.extract_strided_slice %94 {offsets = [0, 64], sizes = [2, 32], strides = [1, 1]} : vector<2x128xf32> to vector<2x32xf32>
    %98 = vector.extract_strided_slice %93 {offsets = [0, 96], sizes = [2, 32], strides = [1, 1]} : vector<2x128xf32> to vector<2x32xf32>
    %99 = arith.mulf %96, %63 : vector<2x32xf32>
    %100 = arith.mulf %95, %97 : vector<2x32xf32>
    %101 = arith.addf %99, %100 : vector<2x32xf32>
    %102 = math.tanh %101 : vector<2x32xf32>
    %103 = arith.mulf %98, %102 : vector<2x32xf32>
    %104 = vector.extract_strided_slice %17 {offsets = [4, 0], sizes = [2, 128], strides = [1, 1]} : vector<16x128xf32> to vector<2x128xf32>
    %cst_29 = arith.constant dense<0.000000e+00> : vector<2x128xf32>
    %105 = tpu.matmul %83, %3, %cst_29 {dimension_numbers = #tpu.dot_dimension_numbers<[1], [0], [0], [1], [0, 0, 1, 1], [], []>} : vector<2x32xf32>, vector<32x128xf32>, vector<2x128xf32> -> vector<2x128xf32>
    %106 = arith.addf %104, %105 : vector<2x128xf32>
    %107 = arith.negf %106 : vector<2x128xf32>
    %108 = math.exp %107 : vector<2x128xf32>
    %cst_30 = arith.constant 1.000000e+00 : f32
    %109 = vector.broadcast %cst_30 : f32 to vector<2x128xf32>
    %110 = arith.addf %109, %108 : vector<2x128xf32>
    %111 = arith.divf %109, %110 : vector<2x128xf32>
    %112 = math.tanh %106 : vector<2x128xf32>
    %113 = vector.extract_strided_slice %111 {offsets = [0, 0], sizes = [2, 32], strides = [1, 1]} : vector<2x128xf32> to vector<2x32xf32>
    %114 = vector.extract_strided_slice %111 {offsets = [0, 32], sizes = [2, 32], strides = [1, 1]} : vector<2x128xf32> to vector<2x32xf32>
    %115 = vector.extract_strided_slice %112 {offsets = [0, 64], sizes = [2, 32], strides = [1, 1]} : vector<2x128xf32> to vector<2x32xf32>
    %116 = vector.extract_strided_slice %111 {offsets = [0, 96], sizes = [2, 32], strides = [1, 1]} : vector<2x128xf32> to vector<2x32xf32>
    %117 = arith.mulf %114, %81 : vector<2x32xf32>
    %118 = arith.mulf %113, %115 : vector<2x32xf32>
    %119 = arith.addf %117, %118 : vector<2x32xf32>
    %120 = math.tanh %119 : vector<2x32xf32>
    %121 = arith.mulf %116, %120 : vector<2x32xf32>
    %cst_31 = arith.constant dense<0.000000e+00> : vector<2x128xf32>
    %122 = tpu.matmul %121, %8, %cst_31 {dimension_numbers = #tpu.dot_dimension_numbers<[1], [0], [0], [1], [0, 0, 1, 1], [], []>} : vector<2x32xf32>, vector<32x128xf32>, vector<2x128xf32> -> vector<2x128xf32>
    %cst_32 = arith.constant dense<0.000000e+00> : vector<2x128xf32>
    %123 = tpu.matmul %103, %9, %cst_32 {dimension_numbers = #tpu.dot_dimension_numbers<[1], [0], [0], [1], [0, 0, 1, 1], [], []>} : vector<2x32xf32>, vector<32x128xf32>, vector<2x128xf32> -> vector<2x128xf32>
    %124 = arith.addf %122, %123 : vector<2x128xf32>
    %125 = vector.broadcast %11 : vector<1x128xf32> to vector<2x128xf32>
    %126 = arith.addf %124, %125 : vector<2x128xf32>
    %127 = arith.negf %126 : vector<2x128xf32>
    %128 = math.exp %127 : vector<2x128xf32>
    %cst_33 = arith.constant 1.000000e+00 : f32
    %129 = vector.broadcast %cst_33 : f32 to vector<2x128xf32>
    %130 = arith.addf %129, %128 : vector<2x128xf32>
    %131 = arith.divf %129, %130 : vector<2x128xf32>
    %132 = math.tanh %126 : vector<2x128xf32>
    %133 = vector.extract_strided_slice %131 {offsets = [0, 0], sizes = [2, 32], strides = [1, 1]} : vector<2x128xf32> to vector<2x32xf32>
    %134 = vector.extract_strided_slice %131 {offsets = [0, 32], sizes = [2, 32], strides = [1, 1]} : vector<2x128xf32> to vector<2x32xf32>
    %135 = vector.extract_strided_slice %132 {offsets = [0, 64], sizes = [2, 32], strides = [1, 1]} : vector<2x128xf32> to vector<2x32xf32>
    %136 = vector.extract_strided_slice %131 {offsets = [0, 96], sizes = [2, 32], strides = [1, 1]} : vector<2x128xf32> to vector<2x32xf32>
    %137 = arith.mulf %134, %101 : vector<2x32xf32>
    %138 = arith.mulf %133, %135 : vector<2x32xf32>
    %139 = arith.addf %137, %138 : vector<2x32xf32>
    %140 = math.tanh %139 : vector<2x32xf32>
    %141 = arith.mulf %136, %140 : vector<2x32xf32>
    %142 = vector.extract_strided_slice %17 {offsets = [6, 0], sizes = [2, 128], strides = [1, 1]} : vector<16x128xf32> to vector<2x128xf32>
    %cst_34 = arith.constant dense<0.000000e+00> : vector<2x128xf32>
    %143 = tpu.matmul %121, %3, %cst_34 {dimension_numbers = #tpu.dot_dimension_numbers<[1], [0], [0], [1], [0, 0, 1, 1], [], []>} : vector<2x32xf32>, vector<32x128xf32>, vector<2x128xf32> -> vector<2x128xf32>
    %144 = arith.addf %142, %143 : vector<2x128xf32>
    %145 = arith.negf %144 : vector<2x128xf32>
    %146 = math.exp %145 : vector<2x128xf32>
    %cst_35 = arith.constant 1.000000e+00 : f32
    %147 = vector.broadcast %cst_35 : f32 to vector<2x128xf32>
    %148 = arith.addf %147, %146 : vector<2x128xf32>
    %149 = arith.divf %147, %148 : vector<2x128xf32>
    %150 = math.tanh %144 : vector<2x128xf32>
    %151 = vector.extract_strided_slice %149 {offsets = [0, 0], sizes = [2, 32], strides = [1, 1]} : vector<2x128xf32> to vector<2x32xf32>
    %152 = vector.extract_strided_slice %149 {offsets = [0, 32], sizes = [2, 32], strides = [1, 1]} : vector<2x128xf32> to vector<2x32xf32>
    %153 = vector.extract_strided_slice %150 {offsets = [0, 64], sizes = [2, 32], strides = [1, 1]} : vector<2x128xf32> to vector<2x32xf32>
    %154 = vector.extract_strided_slice %149 {offsets = [0, 96], sizes = [2, 32], strides = [1, 1]} : vector<2x128xf32> to vector<2x32xf32>
    %155 = arith.mulf %152, %119 : vector<2x32xf32>
    %156 = arith.mulf %151, %153 : vector<2x32xf32>
    %157 = arith.addf %155, %156 : vector<2x32xf32>
    %158 = math.tanh %157 : vector<2x32xf32>
    %159 = arith.mulf %154, %158 : vector<2x32xf32>
    %cst_36 = arith.constant dense<0.000000e+00> : vector<2x128xf32>
    %160 = tpu.matmul %159, %8, %cst_36 {dimension_numbers = #tpu.dot_dimension_numbers<[1], [0], [0], [1], [0, 0, 1, 1], [], []>} : vector<2x32xf32>, vector<32x128xf32>, vector<2x128xf32> -> vector<2x128xf32>
    %cst_37 = arith.constant dense<0.000000e+00> : vector<2x128xf32>
    %161 = tpu.matmul %141, %9, %cst_37 {dimension_numbers = #tpu.dot_dimension_numbers<[1], [0], [0], [1], [0, 0, 1, 1], [], []>} : vector<2x32xf32>, vector<32x128xf32>, vector<2x128xf32> -> vector<2x128xf32>
    %162 = arith.addf %160, %161 : vector<2x128xf32>
    %163 = vector.broadcast %11 : vector<1x128xf32> to vector<2x128xf32>
    %164 = arith.addf %162, %163 : vector<2x128xf32>
    %165 = arith.negf %164 : vector<2x128xf32>
    %166 = math.exp %165 : vector<2x128xf32>
    %cst_38 = arith.constant 1.000000e+00 : f32
    %167 = vector.broadcast %cst_38 : f32 to vector<2x128xf32>
    %168 = arith.addf %167, %166 : vector<2x128xf32>
    %169 = arith.divf %167, %168 : vector<2x128xf32>
    %170 = math.tanh %164 : vector<2x128xf32>
    %171 = vector.extract_strided_slice %169 {offsets = [0, 0], sizes = [2, 32], strides = [1, 1]} : vector<2x128xf32> to vector<2x32xf32>
    %172 = vector.extract_strided_slice %169 {offsets = [0, 32], sizes = [2, 32], strides = [1, 1]} : vector<2x128xf32> to vector<2x32xf32>
    %173 = vector.extract_strided_slice %170 {offsets = [0, 64], sizes = [2, 32], strides = [1, 1]} : vector<2x128xf32> to vector<2x32xf32>
    %174 = vector.extract_strided_slice %169 {offsets = [0, 96], sizes = [2, 32], strides = [1, 1]} : vector<2x128xf32> to vector<2x32xf32>
    %175 = arith.mulf %172, %139 : vector<2x32xf32>
    %176 = arith.mulf %171, %173 : vector<2x32xf32>
    %177 = arith.addf %175, %176 : vector<2x32xf32>
    %178 = math.tanh %177 : vector<2x32xf32>
    %179 = arith.mulf %174, %178 : vector<2x32xf32>
    %180 = vector.extract_strided_slice %17 {offsets = [8, 0], sizes = [2, 128], strides = [1, 1]} : vector<16x128xf32> to vector<2x128xf32>
    %cst_39 = arith.constant dense<0.000000e+00> : vector<2x128xf32>
    %181 = tpu.matmul %159, %3, %cst_39 {dimension_numbers = #tpu.dot_dimension_numbers<[1], [0], [0], [1], [0, 0, 1, 1], [], []>} : vector<2x32xf32>, vector<32x128xf32>, vector<2x128xf32> -> vector<2x128xf32>
    %182 = arith.addf %180, %181 : vector<2x128xf32>
    %183 = arith.negf %182 : vector<2x128xf32>
    %184 = math.exp %183 : vector<2x128xf32>
    %cst_40 = arith.constant 1.000000e+00 : f32
    %185 = vector.broadcast %cst_40 : f32 to vector<2x128xf32>
    %186 = arith.addf %185, %184 : vector<2x128xf32>
    %187 = arith.divf %185, %186 : vector<2x128xf32>
    %188 = math.tanh %182 : vector<2x128xf32>
    %189 = vector.extract_strided_slice %187 {offsets = [0, 0], sizes = [2, 32], strides = [1, 1]} : vector<2x128xf32> to vector<2x32xf32>
    %190 = vector.extract_strided_slice %187 {offsets = [0, 32], sizes = [2, 32], strides = [1, 1]} : vector<2x128xf32> to vector<2x32xf32>
    %191 = vector.extract_strided_slice %188 {offsets = [0, 64], sizes = [2, 32], strides = [1, 1]} : vector<2x128xf32> to vector<2x32xf32>
    %192 = vector.extract_strided_slice %187 {offsets = [0, 96], sizes = [2, 32], strides = [1, 1]} : vector<2x128xf32> to vector<2x32xf32>
    %193 = arith.mulf %190, %157 : vector<2x32xf32>
    %194 = arith.mulf %189, %191 : vector<2x32xf32>
    %195 = arith.addf %193, %194 : vector<2x32xf32>
    %196 = math.tanh %195 : vector<2x32xf32>
    %197 = arith.mulf %192, %196 : vector<2x32xf32>
    %cst_41 = arith.constant dense<0.000000e+00> : vector<2x128xf32>
    %198 = tpu.matmul %197, %8, %cst_41 {dimension_numbers = #tpu.dot_dimension_numbers<[1], [0], [0], [1], [0, 0, 1, 1], [], []>} : vector<2x32xf32>, vector<32x128xf32>, vector<2x128xf32> -> vector<2x128xf32>
    %cst_42 = arith.constant dense<0.000000e+00> : vector<2x128xf32>
    %199 = tpu.matmul %179, %9, %cst_42 {dimension_numbers = #tpu.dot_dimension_numbers<[1], [0], [0], [1], [0, 0, 1, 1], [], []>} : vector<2x32xf32>, vector<32x128xf32>, vector<2x128xf32> -> vector<2x128xf32>
    %200 = arith.addf %198, %199 : vector<2x128xf32>
    %201 = vector.broadcast %11 : vector<1x128xf32> to vector<2x128xf32>
    %202 = arith.addf %200, %201 : vector<2x128xf32>
    %203 = arith.negf %202 : vector<2x128xf32>
    %204 = math.exp %203 : vector<2x128xf32>
    %cst_43 = arith.constant 1.000000e+00 : f32
    %205 = vector.broadcast %cst_43 : f32 to vector<2x128xf32>
    %206 = arith.addf %205, %204 : vector<2x128xf32>
    %207 = arith.divf %205, %206 : vector<2x128xf32>
    %208 = math.tanh %202 : vector<2x128xf32>
    %209 = vector.extract_strided_slice %207 {offsets = [0, 0], sizes = [2, 32], strides = [1, 1]} : vector<2x128xf32> to vector<2x32xf32>
    %210 = vector.extract_strided_slice %207 {offsets = [0, 32], sizes = [2, 32], strides = [1, 1]} : vector<2x128xf32> to vector<2x32xf32>
    %211 = vector.extract_strided_slice %208 {offsets = [0, 64], sizes = [2, 32], strides = [1, 1]} : vector<2x128xf32> to vector<2x32xf32>
    %212 = vector.extract_strided_slice %207 {offsets = [0, 96], sizes = [2, 32], strides = [1, 1]} : vector<2x128xf32> to vector<2x32xf32>
    %213 = arith.mulf %210, %177 : vector<2x32xf32>
    %214 = arith.mulf %209, %211 : vector<2x32xf32>
    %215 = arith.addf %213, %214 : vector<2x32xf32>
    %216 = math.tanh %215 : vector<2x32xf32>
    %217 = arith.mulf %212, %216 : vector<2x32xf32>
    %218 = vector.extract_strided_slice %17 {offsets = [10, 0], sizes = [2, 128], strides = [1, 1]} : vector<16x128xf32> to vector<2x128xf32>
    %cst_44 = arith.constant dense<0.000000e+00> : vector<2x128xf32>
    %219 = tpu.matmul %197, %3, %cst_44 {dimension_numbers = #tpu.dot_dimension_numbers<[1], [0], [0], [1], [0, 0, 1, 1], [], []>} : vector<2x32xf32>, vector<32x128xf32>, vector<2x128xf32> -> vector<2x128xf32>
    %220 = arith.addf %218, %219 : vector<2x128xf32>
    %221 = arith.negf %220 : vector<2x128xf32>
    %222 = math.exp %221 : vector<2x128xf32>
    %cst_45 = arith.constant 1.000000e+00 : f32
    %223 = vector.broadcast %cst_45 : f32 to vector<2x128xf32>
    %224 = arith.addf %223, %222 : vector<2x128xf32>
    %225 = arith.divf %223, %224 : vector<2x128xf32>
    %226 = math.tanh %220 : vector<2x128xf32>
    %227 = vector.extract_strided_slice %225 {offsets = [0, 0], sizes = [2, 32], strides = [1, 1]} : vector<2x128xf32> to vector<2x32xf32>
    %228 = vector.extract_strided_slice %225 {offsets = [0, 32], sizes = [2, 32], strides = [1, 1]} : vector<2x128xf32> to vector<2x32xf32>
    %229 = vector.extract_strided_slice %226 {offsets = [0, 64], sizes = [2, 32], strides = [1, 1]} : vector<2x128xf32> to vector<2x32xf32>
    %230 = vector.extract_strided_slice %225 {offsets = [0, 96], sizes = [2, 32], strides = [1, 1]} : vector<2x128xf32> to vector<2x32xf32>
    %231 = arith.mulf %228, %195 : vector<2x32xf32>
    %232 = arith.mulf %227, %229 : vector<2x32xf32>
    %233 = arith.addf %231, %232 : vector<2x32xf32>
    %234 = math.tanh %233 : vector<2x32xf32>
    %235 = arith.mulf %230, %234 : vector<2x32xf32>
    %cst_46 = arith.constant dense<0.000000e+00> : vector<2x128xf32>
    %236 = tpu.matmul %235, %8, %cst_46 {dimension_numbers = #tpu.dot_dimension_numbers<[1], [0], [0], [1], [0, 0, 1, 1], [], []>} : vector<2x32xf32>, vector<32x128xf32>, vector<2x128xf32> -> vector<2x128xf32>
    %cst_47 = arith.constant dense<0.000000e+00> : vector<2x128xf32>
    %237 = tpu.matmul %217, %9, %cst_47 {dimension_numbers = #tpu.dot_dimension_numbers<[1], [0], [0], [1], [0, 0, 1, 1], [], []>} : vector<2x32xf32>, vector<32x128xf32>, vector<2x128xf32> -> vector<2x128xf32>
    %238 = arith.addf %236, %237 : vector<2x128xf32>
    %239 = vector.broadcast %11 : vector<1x128xf32> to vector<2x128xf32>
    %240 = arith.addf %238, %239 : vector<2x128xf32>
    %241 = arith.negf %240 : vector<2x128xf32>
    %242 = math.exp %241 : vector<2x128xf32>
    %cst_48 = arith.constant 1.000000e+00 : f32
    %243 = vector.broadcast %cst_48 : f32 to vector<2x128xf32>
    %244 = arith.addf %243, %242 : vector<2x128xf32>
    %245 = arith.divf %243, %244 : vector<2x128xf32>
    %246 = math.tanh %240 : vector<2x128xf32>
    %247 = vector.extract_strided_slice %245 {offsets = [0, 0], sizes = [2, 32], strides = [1, 1]} : vector<2x128xf32> to vector<2x32xf32>
    %248 = vector.extract_strided_slice %245 {offsets = [0, 32], sizes = [2, 32], strides = [1, 1]} : vector<2x128xf32> to vector<2x32xf32>
    %249 = vector.extract_strided_slice %246 {offsets = [0, 64], sizes = [2, 32], strides = [1, 1]} : vector<2x128xf32> to vector<2x32xf32>
    %250 = vector.extract_strided_slice %245 {offsets = [0, 96], sizes = [2, 32], strides = [1, 1]} : vector<2x128xf32> to vector<2x32xf32>
    %251 = arith.mulf %248, %215 : vector<2x32xf32>
    %252 = arith.mulf %247, %249 : vector<2x32xf32>
    %253 = arith.addf %251, %252 : vector<2x32xf32>
    %254 = math.tanh %253 : vector<2x32xf32>
    %255 = arith.mulf %250, %254 : vector<2x32xf32>
    %256 = vector.extract_strided_slice %17 {offsets = [12, 0], sizes = [2, 128], strides = [1, 1]} : vector<16x128xf32> to vector<2x128xf32>
    %cst_49 = arith.constant dense<0.000000e+00> : vector<2x128xf32>
    %257 = tpu.matmul %235, %3, %cst_49 {dimension_numbers = #tpu.dot_dimension_numbers<[1], [0], [0], [1], [0, 0, 1, 1], [], []>} : vector<2x32xf32>, vector<32x128xf32>, vector<2x128xf32> -> vector<2x128xf32>
    %258 = arith.addf %256, %257 : vector<2x128xf32>
    %259 = arith.negf %258 : vector<2x128xf32>
    %260 = math.exp %259 : vector<2x128xf32>
    %cst_50 = arith.constant 1.000000e+00 : f32
    %261 = vector.broadcast %cst_50 : f32 to vector<2x128xf32>
    %262 = arith.addf %261, %260 : vector<2x128xf32>
    %263 = arith.divf %261, %262 : vector<2x128xf32>
    %264 = math.tanh %258 : vector<2x128xf32>
    %265 = vector.extract_strided_slice %263 {offsets = [0, 0], sizes = [2, 32], strides = [1, 1]} : vector<2x128xf32> to vector<2x32xf32>
    %266 = vector.extract_strided_slice %263 {offsets = [0, 32], sizes = [2, 32], strides = [1, 1]} : vector<2x128xf32> to vector<2x32xf32>
    %267 = vector.extract_strided_slice %264 {offsets = [0, 64], sizes = [2, 32], strides = [1, 1]} : vector<2x128xf32> to vector<2x32xf32>
    %268 = vector.extract_strided_slice %263 {offsets = [0, 96], sizes = [2, 32], strides = [1, 1]} : vector<2x128xf32> to vector<2x32xf32>
    %269 = arith.mulf %266, %233 : vector<2x32xf32>
    %270 = arith.mulf %265, %267 : vector<2x32xf32>
    %271 = arith.addf %269, %270 : vector<2x32xf32>
    %272 = math.tanh %271 : vector<2x32xf32>
    %273 = arith.mulf %268, %272 : vector<2x32xf32>
    %cst_51 = arith.constant dense<0.000000e+00> : vector<2x128xf32>
    %274 = tpu.matmul %273, %8, %cst_51 {dimension_numbers = #tpu.dot_dimension_numbers<[1], [0], [0], [1], [0, 0, 1, 1], [], []>} : vector<2x32xf32>, vector<32x128xf32>, vector<2x128xf32> -> vector<2x128xf32>
    %cst_52 = arith.constant dense<0.000000e+00> : vector<2x128xf32>
    %275 = tpu.matmul %255, %9, %cst_52 {dimension_numbers = #tpu.dot_dimension_numbers<[1], [0], [0], [1], [0, 0, 1, 1], [], []>} : vector<2x32xf32>, vector<32x128xf32>, vector<2x128xf32> -> vector<2x128xf32>
    %276 = arith.addf %274, %275 : vector<2x128xf32>
    %277 = vector.broadcast %11 : vector<1x128xf32> to vector<2x128xf32>
    %278 = arith.addf %276, %277 : vector<2x128xf32>
    %279 = arith.negf %278 : vector<2x128xf32>
    %280 = math.exp %279 : vector<2x128xf32>
    %cst_53 = arith.constant 1.000000e+00 : f32
    %281 = vector.broadcast %cst_53 : f32 to vector<2x128xf32>
    %282 = arith.addf %281, %280 : vector<2x128xf32>
    %283 = arith.divf %281, %282 : vector<2x128xf32>
    %284 = math.tanh %278 : vector<2x128xf32>
    %285 = vector.extract_strided_slice %283 {offsets = [0, 0], sizes = [2, 32], strides = [1, 1]} : vector<2x128xf32> to vector<2x32xf32>
    %286 = vector.extract_strided_slice %283 {offsets = [0, 32], sizes = [2, 32], strides = [1, 1]} : vector<2x128xf32> to vector<2x32xf32>
    %287 = vector.extract_strided_slice %284 {offsets = [0, 64], sizes = [2, 32], strides = [1, 1]} : vector<2x128xf32> to vector<2x32xf32>
    %288 = vector.extract_strided_slice %283 {offsets = [0, 96], sizes = [2, 32], strides = [1, 1]} : vector<2x128xf32> to vector<2x32xf32>
    %289 = arith.mulf %286, %253 : vector<2x32xf32>
    %290 = arith.mulf %285, %287 : vector<2x32xf32>
    %291 = arith.addf %289, %290 : vector<2x32xf32>
    %292 = math.tanh %291 : vector<2x32xf32>
    %293 = arith.mulf %288, %292 : vector<2x32xf32>
    %294 = vector.extract_strided_slice %17 {offsets = [14, 0], sizes = [2, 128], strides = [1, 1]} : vector<16x128xf32> to vector<2x128xf32>
    %cst_54 = arith.constant dense<0.000000e+00> : vector<2x128xf32>
    %295 = tpu.matmul %273, %3, %cst_54 {dimension_numbers = #tpu.dot_dimension_numbers<[1], [0], [0], [1], [0, 0, 1, 1], [], []>} : vector<2x32xf32>, vector<32x128xf32>, vector<2x128xf32> -> vector<2x128xf32>
    %296 = arith.addf %294, %295 : vector<2x128xf32>
    %297 = arith.negf %296 : vector<2x128xf32>
    %298 = math.exp %297 : vector<2x128xf32>
    %cst_55 = arith.constant 1.000000e+00 : f32
    %299 = vector.broadcast %cst_55 : f32 to vector<2x128xf32>
    %300 = arith.addf %299, %298 : vector<2x128xf32>
    %301 = arith.divf %299, %300 : vector<2x128xf32>
    %302 = math.tanh %296 : vector<2x128xf32>
    %303 = vector.extract_strided_slice %301 {offsets = [0, 0], sizes = [2, 32], strides = [1, 1]} : vector<2x128xf32> to vector<2x32xf32>
    %304 = vector.extract_strided_slice %301 {offsets = [0, 32], sizes = [2, 32], strides = [1, 1]} : vector<2x128xf32> to vector<2x32xf32>
    %305 = vector.extract_strided_slice %302 {offsets = [0, 64], sizes = [2, 32], strides = [1, 1]} : vector<2x128xf32> to vector<2x32xf32>
    %306 = vector.extract_strided_slice %301 {offsets = [0, 96], sizes = [2, 32], strides = [1, 1]} : vector<2x128xf32> to vector<2x32xf32>
    %307 = arith.mulf %304, %271 : vector<2x32xf32>
    %308 = arith.mulf %303, %305 : vector<2x32xf32>
    %309 = arith.addf %307, %308 : vector<2x32xf32>
    %310 = math.tanh %309 : vector<2x32xf32>
    %311 = arith.mulf %306, %310 : vector<2x32xf32>
    %cst_56 = arith.constant dense<0.000000e+00> : vector<2x128xf32>
    %312 = tpu.matmul %311, %8, %cst_56 {dimension_numbers = #tpu.dot_dimension_numbers<[1], [0], [0], [1], [0, 0, 1, 1], [], []>} : vector<2x32xf32>, vector<32x128xf32>, vector<2x128xf32> -> vector<2x128xf32>
    %cst_57 = arith.constant dense<0.000000e+00> : vector<2x128xf32>
    %313 = tpu.matmul %293, %9, %cst_57 {dimension_numbers = #tpu.dot_dimension_numbers<[1], [0], [0], [1], [0, 0, 1, 1], [], []>} : vector<2x32xf32>, vector<32x128xf32>, vector<2x128xf32> -> vector<2x128xf32>
    %314 = arith.addf %312, %313 : vector<2x128xf32>
    %315 = vector.broadcast %11 : vector<1x128xf32> to vector<2x128xf32>
    %316 = arith.addf %314, %315 : vector<2x128xf32>
    %317 = arith.negf %316 : vector<2x128xf32>
    %318 = math.exp %317 : vector<2x128xf32>
    %cst_58 = arith.constant 1.000000e+00 : f32
    %319 = vector.broadcast %cst_58 : f32 to vector<2x128xf32>
    %320 = arith.addf %319, %318 : vector<2x128xf32>
    %321 = arith.divf %319, %320 : vector<2x128xf32>
    %322 = math.tanh %316 : vector<2x128xf32>
    %323 = vector.extract_strided_slice %321 {offsets = [0, 0], sizes = [2, 32], strides = [1, 1]} : vector<2x128xf32> to vector<2x32xf32>
    %324 = vector.extract_strided_slice %321 {offsets = [0, 32], sizes = [2, 32], strides = [1, 1]} : vector<2x128xf32> to vector<2x32xf32>
    %325 = vector.extract_strided_slice %322 {offsets = [0, 64], sizes = [2, 32], strides = [1, 1]} : vector<2x128xf32> to vector<2x32xf32>
    %326 = vector.extract_strided_slice %321 {offsets = [0, 96], sizes = [2, 32], strides = [1, 1]} : vector<2x128xf32> to vector<2x32xf32>
    %327 = arith.mulf %324, %291 : vector<2x32xf32>
    %328 = arith.mulf %323, %325 : vector<2x32xf32>
    %329 = arith.addf %327, %328 : vector<2x32xf32>
    %330 = math.tanh %329 : vector<2x32xf32>
    %331 = arith.mulf %326, %330 : vector<2x32xf32>
    %332 = vector.shape_cast %311 : vector<2x32xf32> to vector<2x1x32xf32>
    %333 = vector.shape_cast %331 : vector<2x32xf32> to vector<2x1x32xf32>
    %334 = tpu.concatenate %332, %333 in 1 : vector<2x1x32xf32>, vector<2x1x32xf32> -> vector<2x2x32xf32>
    %c0_59 = arith.constant 0 : index
    %c0_60 = arith.constant 0 : index
    %c0_61 = arith.constant 0 : index
    %335 = vector.load %arg7[%c0_59, %c0_60, %c0_61] : memref<2x2x32xf32, #tpu.memory_space<vmem>>, vector<2x2x32xf32>
    tpu.vector_store %arg7[%c0_59, %c0_60, %c0_61], %334 {strides = array<i32>} : memref<2x2x32xf32, #tpu.memory_space<vmem>>, vector<2x2x32xf32>,
    %336 = vector.shape_cast %309 : vector<2x32xf32> to vector<2x1x32xf32>
    %337 = vector.shape_cast %329 : vector<2x32xf32> to vector<2x1x32xf32>
    %338 = tpu.concatenate %336, %337 in 1 : vector<2x1x32xf32>, vector<2x1x32xf32> -> vector<2x2x32xf32>
    %c0_62 = arith.constant 0 : index
    %c0_63 = arith.constant 0 : index
    %c0_64 = arith.constant 0 : index
    %339 = vector.load %arg8[%c0_62, %c0_63, %c0_64] : memref<2x2x32xf32, #tpu.memory_space<vmem>>, vector<2x2x32xf32>
    tpu.vector_store %arg8[%c0_62, %c0_63, %c0_64], %338 {strides = array<i32>} : memref<2x2x32xf32, #tpu.memory_space<vmem>>, vector<2x2x32xf32>,
    %cst_65 = arith.constant 2.000000e+01 : f32
    %340 = vector.broadcast %cst_65 : f32 to vector<2x32xf32>
    %341 = arith.cmpf ogt, %331, %340 : vector<2x32xf32>
    %cst_66 = arith.constant 2.000000e+01 : f32
    %342 = vector.broadcast %cst_66 : f32 to vector<2x32xf32>
    %343 = arith.minimumf %331, %342 : vector<2x32xf32>
    %344 = math.exp %343 : vector<2x32xf32>
    %345 = math.log1p %344 : vector<2x32xf32>
    %346 = arith.select %341, %331, %345 : vector<2x32xi1>, vector<2x32xf32>
    %347 = vector.shape_cast %346 : vector<2x32xf32> to vector<2x1x32xf32>
    %c0_67 = arith.constant 0 : index
    %c0_68 = arith.constant 0 : index
    %c0_69 = arith.constant 0 : index
    %348 = vector.load %arg6[%c0_67, %c0_68, %c0_69] : memref<2x1x32xf32, #tpu.memory_space<vmem>>, vector<2x1x32xf32>
    tpu.vector_store %arg6[%c0_67, %c0_68, %c0_69], %347 {strides = array<i32>} : memref<2x1x32xf32, #tpu.memory_space<vmem>>, vector<2x1x32xf32>,
    return
  }
  func.func @transform_0(%arg0: i32) -> (i32, i32, i32) {
    %c0_i32 = arith.constant 0 : i32
    %c0_i32_0 = arith.constant 0 : i32
    %c0_i32_1 = arith.constant 0 : i32
    return %arg0, %c0_i32, %c0_i32_0 : i32, i32, i32
  }
  func.func @transform_1(%arg0: i32) -> (i32, i32, i32) {
    %c0_i32 = arith.constant 0 : i32
    %c0_i32_0 = arith.constant 0 : i32
    %c0_i32_1 = arith.constant 0 : i32
    %c0_i32_2 = arith.constant 0 : i32
    return %c0_i32, %c0_i32_0, %c0_i32_1 : i32, i32, i32
  }
  func.func @transform_2(%arg0: i32) -> (i32, i32, i32) {
    %c0_i32 = arith.constant 0 : i32
    %c0_i32_0 = arith.constant 0 : i32
    %c0_i32_1 = arith.constant 0 : i32
    %c0_i32_2 = arith.constant 0 : i32
    return %c0_i32, %c0_i32_0, %c0_i32_1 : i32, i32, i32
  }
  func.func @transform_3(%arg0: i32) -> (i32, i32, i32) {
    %c0_i32 = arith.constant 0 : i32
    %c0_i32_0 = arith.constant 0 : i32
    %c0_i32_1 = arith.constant 0 : i32
    return %arg0, %c0_i32, %c0_i32_0 : i32, i32, i32
  }
  func.func @transform_4(%arg0: i32) -> (i32, i32, i32) {
    %c0_i32 = arith.constant 0 : i32
    %c0_i32_0 = arith.constant 0 : i32
    %c0_i32_1 = arith.constant 0 : i32
    return %arg0, %c0_i32, %c0_i32_0 : i32, i32, i32
  }
  func.func @transform_5(%arg0: i32) -> (i32, i32, i32) {
    %c0_i32 = arith.constant 0 : i32
    %c0_i32_0 = arith.constant 0 : i32
    %c0_i32_1 = arith.constant 0 : i32
    return %arg0, %c0_i32, %c0_i32_0 : i32, i32, i32
  }
  func.func @transform_6(%arg0: i32) -> (i32, i32, i32) {
    %c0_i32 = arith.constant 0 : i32
    %c0_i32_0 = arith.constant 0 : i32
    %c0_i32_1 = arith.constant 0 : i32
    return %arg0, %c0_i32, %c0_i32_0 : i32, i32, i32
  }
  func.func @transform_7(%arg0: i32) -> (i32, i32, i32) {
    %c0_i32 = arith.constant 0 : i32
    %c0_i32_0 = arith.constant 0 : i32
    %c0_i32_1 = arith.constant 0 : i32
    return %arg0, %c0_i32, %c0_i32_0 : i32, i32, i32
  }
}

</mosaic_0001>

<bundles_post_ra>
// kernel: decoder_forward.1
= control target key start
LH: loop header
LB: loop body
LE: loop exit
PB: predicated region body
PF: predicated region fallthrough
CT: control target
= control target key end

     0   :  { %13 = vsyncpa [#allocation3], 0  ;;  %s4003_s0 = inlined_call_operand.vmem [shape: f32[2,8,32], index: 0, kind: input, shape index: {}]   ;;  %s4004_s1 = inlined_call_operand.hbm [shape: f32[2,64,128], index: 1, kind: input, shape index: {}]   ;;  %s4005_s2 = inlined_call_operand.vmem [shape: f32[2,1,128], index: 2, kind: input, shape index: {}]   ;;  %s4006_s3 = inlined_call_operand.vmem [shape: f32[2,2,32], index: 3, kind: input, shape index: {}, may-alias: {3,6}]   ;;  %s4007_s4 = inlined_call_operand.vmem [shape: f32[2,2,32], index: 4, kind: input, shape index: {}, may-alias: {4,7}]   ;;  %s4008_s5 = inlined_call_operand.hbm [shape: f32[2,1,32], index: 5, kind: output, shape index: {0}]   ;;  %s4009_s6 = inlined_call_operand.vmem [shape: f32[2,2,32], index: 6, kind: output, shape index: {1}, may-alias: {3,6}]   ;;  %s4010_s7 = inlined_call_operand.vmem [shape: f32[2,2,32], index: 7, kind: output, shape index: {2}, may-alias: {4,7}]  }
   0x1   :  { %14 = vsyncpa [#allocation4], 0  ;;  %s3506_s24 = smov [#allocation2]   ;;  %s3458_s28 = scalar_lea.hbm %s4004_s1, 2048 }
   0x2   :  { %s22_s25 = sshll.u32 %s3506_s24, 4  ;;  %p3459_p0 = scmp.ne.s32.totalorder %s4004_s1, %s3458_s28  ;;  %s23_s25 = int_to_ptr.vmem [resolvable:$true] %s22_s25 }
   0x3   :  { %p3462_p1 = scmp.lt.u32.totalorder %s3458_s28, %s4004_s1 }
   0x5   :  { %p3464_p2 = pnand %p3462_p1, %p3459_p0 }
   0x7   :  { %3467 = shalt.err (!%p3464_p2)
}
   0x8   :  { %s3468_s10 = scalar_lea.vmem %s23_s25, 2048  ;;  %p3473_p4 = scmp.lt.s32.totalorder %s23_s25, %s23_s25 }
   0x9   :  { %p3469_p3 = scmp.ne.s32.totalorder %s23_s25, %s3468_s10  ;;  %p3474_p5 = scmp.lt.s32.totalorder %s3468_s10, %s3468_s10 }
   0xb   :  { %p3475_p6 = por %p3474_p5, %p3473_p4 }
   0xd   :  { %p3476_p7 = pnand %p3475_p6, %p3469_p3 }
   0xf   :  { %3479 = shalt.err (!%p3476_p7)
}
  0x10   :  { %s3507_s11 = smov 128   ;;  %s3508_s12 = smov 8  }
  0x11   :  { %28 = dma.hbm_to_vmem [thread:$0]  %s4004_s1, 2048, %s23_s25, [#allocation3], %s3507_s11, %s3507_s11, %s3508_s12  }
  0x12   :  { %3502 = dma.done.wait [#allocation3], 2048  }
  0x13   :  { %3503 = vsyncadd [#allocation3], 4294965248  ;;  %v64_v0 = vlaneseq  ;;  %v3509_v1 = vmov 0.0|0.0   ;;  %v3510_v2 = vmov 1983009808   ;;  %vm3512_vm0 = vmmov 0  }
  0x14   :  { %3167 = vmatprep.subr.bf16.mxu1 %v3509_v1  ;;  %v62_v3 = vunpack.c.l.s4 %v3510_v2  ;;  %v3511_v5 = vmov 1934713408   ;;  %v3513_v8 = vmov 0.0   ;;  %v38_v11 = vld [vmem:[#allocation2] sm:$0xff]  ;;  %v39_v12 = vld [vmem:[#allocation2 + $0x8] sm:$0xff]  ;;  %v40_v16 = vld [vmem:[#allocation2 + $0x10] sm:$0xff] }
  0x15   :  { %v3574_v4 = vshrl.u32 %v64_v0, 7  ;;  %v93_v6 = vunpack.c.l.s4 %v3511_v5  ;;  %2903 = vmatprep.mubr.msk.f32.mxu1 %vm3512_vm0, %v3513_v8  ;;  %v42_v13 = vld [vmem:[#allocation2 + $0x20] sm:$0xff]  ;;  %v3159_v14 = vpack.c.bf16 %v39_v12, %v38_v11  ;;  %v43_v15 = vld [vmem:[#allocation2 + $0x28] sm:$0xff]  ;;  %v41_v17 = vld [vmem:[#allocation2 + $0x18] sm:$0xff]  ;;  %vm261_vm1 = vcmask 1041409   ;;  %s3514_s26 = smov 64  }
  0x16   :  { %v63_v7 = vunpack.c.0.s8 %v62_v3  ;;  %v3579_v18 = vpack.c.bf16 %v43_v15, %v42_v13  ;;  %v3163_v19 = vpack.c.bf16 %v41_v17, %v40_v16  ;;  %v58_v20 = vld [vmem:[%s4003_s0] sm:$0xff]  ;;  %v59_v21 = vld [vmem:[%s4003_s0 + $0x8] sm:$0xff]  ;;  %v44_v23 = vld [vmem:[#allocation2 + $0x30] sm:$0xff]  ;;  %vm174_vm2 = vcmask 261120   ;;  %s3515_s27 = smov 32   ;;  %s3518_s10 = smov [#allocation5]  }
  0x17   :  { %v94_v9 = vunpack.c.0.s8 %v93_v6  ;;  %3160 = vmatprep.subr.bf16.mxu0 %v3159_v14  ;;  %v60_v24 = vcombine.high %v58_v20, %v3513_v8  ;;  %v75_v26 = vcombine.high %v59_v21, %v3513_v8  ;;  %v45_v28 = vld [vmem:[#allocation2 + $0x38] sm:$0xff]  ;;  %v3593_v29 = vld [vmem:[%s4006_s3 + $0x2] sm:$0x3]  ;;  %v3603_v35 = vld [vmem:[%s4006_s3] sm:$0x3]  ;;  %vm2547_vm3 = vcmask 1040384  }
  0x18   :  { %v66_v10 = vsub.s32 %v63_v7, %v3574_v4  ;;  %3162 = vmatpush3.bf16.msra.mxu0 %v3159_v14  ;;  %3169 = vmatpush3.bf16.msra.mxu1 %v3579_v18  ;;  %v3596_v30 = vpack.c.bf16 %v45_v28, %v44_v23  ;;  %v260_v31 = vrot.slane %v3593_v29, 7  ;;  %v2714_v60 = vld [vmem:[%s4005_s2] ss:$0 sm:$0xff]  ;;  %v3632_v3 = vld [vmem:[%s4007_s4 + $0x2] sm:$0x3]  ;;  %v54_v23 = vld [vmem:[#allocation2 + $0x70] sm:$0xff] }
  0x19   :  { %v97_v22 = vsub.s32 %v94_v9, %v3574_v4  ;;  %3164 = vmatprep.subr.bf16.mxu0 %v3163_v19  ;;  %3170 = vmatprep.subr.bf16.mxu1 %v3509_v1  ;;  %v345_v5 = vrot.slane %v3632_v3, 7  ;;  %v3638_v6 = vld [vmem:[%s4007_s4] sm:$0x3]  ;;  %vm2558_vm6 = vcmask 254976   ;;  %s2693_s11 = sshll.u32 %s3518_s10, 4  ;;  %vm2685_vm7 = vcmask 253952   ;;  %s2694_s11 = int_to_ptr.vmem [resolvable:$true] %s2693_s11 }
  0x1a   :  { %v67_v25 = vrot.slane %v58_v20, %v66_v10  ;;  %v82_v27 = vrot.slane %v59_v21, %v66_v10  ;;  %v74_v32 = vrot.slane %v60_v24, %v66_v10  ;;  %v89_v33 = vrot.slane %v75_v26, %v66_v10  ;;  %v52_v21 = vld [vmem:[#allocation2 + $0x60] sm:$0xff]  ;;  %s3480_s12 = scalar_lea.vmem %s2694_s11, 32  ;;  %p3485_p9 = scmp.lt.s32.totalorder %s2694_s11, %s2694_s11 }
  0x1b   :  { %v262_v41 = vsel %vm261_vm1, %v260_v31, %v3603_v35  ;;  %v346_v9 = vsel %vm261_vm1, %v345_v5, %v3638_v6  ;;  %v48_v26 = vld [vmem:[#allocation2 + $0x40] sm:$0xff]  ;;  %v50_v31 = vld [vmem:[#allocation2 + $0x50] sm:$0xff]  ;;  %p3481_p8 = scmp.ne.s32.totalorder %s2694_s11, %s3480_s12  ;;  %p3486_p10 = scmp.lt.s32.totalorder %s3480_s12, %s3480_s12 }
  0x1c   :  { %v90_v34 = vcombine.low %v67_v25, %v82_v27  ;;  %v91_v36 = vcombine.high %v67_v25, %v82_v27  ;;  %v106_v38 = vcombine.low %v74_v32, %v89_v33  ;;  %v107_v39 = vcombine.high %v74_v32, %v89_v33  ;;  %3166 = vmatpush3.bf16.msra.mxu0 %v3163_v19  ;;  %v55_v25 = vld [vmem:[#allocation2 + $0x78] sm:$0xff]  ;;  %v49_v27 = vld [vmem:[#allocation2 + $0x48] sm:$0xff] }
  0x1d   :  { %3172 = vmatpush3.bf16.msra.mxu1 %v3596_v30  ;;  %3173 = vmatprep.subr.bf16.mxu0 %v3509_v1  ;;  %v3650_v28 = vpack.c.bf16 %v49_v27, %v48_v26  ;;  %v51_v32 = vld [vmem:[#allocation2 + $0x58] sm:$0xff]  ;;  %v367_v33 = vrot.slane %v3603_v35, 1  ;;  %p3487_p11 = por %p3486_p10, %p3485_p9 }
  0x1e   :  { %v98_v37 = vrot.slane %v90_v34, %v97_v22  ;;  %v105_v40 = vrot.slane %v91_v36, %v97_v22  ;;  %v114_v43 = vrot.slane %v106_v38, %v97_v22  ;;  %v121_v44 = vrot.slane %v107_v39, %v97_v22  ;;  %3179 = vmatprep.subr.bf16.mxu1 %v3509_v1  ;;  %v53_v22 = vld [vmem:[#allocation2 + $0x68] sm:$0xff] }
  0x1f   :  { %v3648_v24 = vpack.c.bf16 %v53_v22, %v52_v21  ;;  %v3654_v34 = vpack.c.bf16 %v55_v25, %v54_v23  ;;  %v3658_v36 = vpack.c.bf16 %v51_v32, %v50_v31  ;;  %p3488_p12 = pnand %p3487_p11, %p3481_p8 }
  0x20   :  { %v122_v42 = vcombine.high %v98_v37, %v3513_v8  ;;  %v123_v45 = vcombine.high %v105_v40, %v3513_v8  ;;  %v124_v47 = vcombine.high %v114_v43, %v3513_v8  ;;  %v125_v48 = vcombine.high %v121_v44, %v3513_v8  ;;  %2904 = vmatmul.mubr.msk.f32.vlgmr.msra.gmra.mrb[0].mxu1 %vm174_vm2, %v262_v41 }
  0x21   :  { %2925 = vmatprep.mubr.msk.f32.mxu1 %vm3512_vm0, %v3513_v8  ;;  %3181 = vmatpush3.bf16.msra.mxu1 %v3650_v28 }
  0x22   :  { %v140_v46 = vcombine.low %v98_v37, %v122_v42  ;;  %v141_v49 = vcombine.low %v105_v40, %v123_v45  ;;  %v157_v51 = vcombine.low %v114_v43, %v124_v47  ;;  %v158_v52 = vcombine.low %v121_v44, %v125_v48  ;;  %3182 = vmatprep.subr.bf16.mxu1 %v3509_v1  ;;  %v3693_v42 = vld [vmem:[%s4005_s2 + $0x1] ss:$0 sm:$0xff]  ;;  %s3517_s2 = smov 96  }
  0x23   :  { %v368_v37 = vsel %vm261_vm1, %v3593_v29, %v367_v33 }
  0x24   :  { %v148_v50 = vrot.slane %v140_v46, %v66_v10  ;;  %v155_v53 = vrot.slane %v141_v49, %v66_v10  ;;  %v165_v54 = vrot.slane %v157_v51, %v66_v10  ;;  %v172_v55 = vrot.slane %v158_v52, %v66_v10 }
  0x25   :  { %3184 = vmatpush3.bf16.msra.mxu1 %v3658_v36  ;;  %v530_v51 = vrot.slane %v3638_v6, 1 }
  0x26   :  { %v156_v56 = vcombine.low %v148_v50, %v155_v53  ;;  %v173_v57 = vcombine.low %v165_v54, %v172_v55  ;;  %3191 = vmatprep.subr.bf16.mxu1 %v3509_v1 }
  0x27   :  { %v531_v54 = vsel %vm261_vm1, %v3632_v3, %v530_v51 }
  0x28   :  { %2892 = vmatprep.mubr.msk.f32.mxu0 %vm174_vm2, %v156_v56 }
  0x29   :  { %2893 = vmatmul.mubr.msk.f32.vlgmr.msra.gmra.mrb[0].mxu0 %vm174_vm2, %v173_v57 }
  0x2a   :  { %2914 = vmatprep.mubr.msk.f32.mxu0 %vm3512_vm0, %v3513_v8  ;;  %3175 = vmatpush3.bf16.msra.mxu0 %v3648_v24 }
  0x2b   :  { %3176 = vmatprep.subr.bf16.mxu0 %v3509_v1 }
  0x2e   :  { %3178 = vmatpush3.bf16.msra.mxu0 %v3654_v34 }
  0x2f   :  { %3185 = vmatprep.subr.bf16.mxu0 %v3509_v1 }
  0x31   :  { %2915 = vmatmul.mubr.msk.f32.vlgmr.msra.gmra.mrb[2].mxu0 %vm174_vm2, %v368_v37 }
  0x32   :  { %3187 = vmatpush3.bf16.msra.mxu0 %v3579_v18  ;;  %2936 = vmatprep.mubr.msk.f32.mxu0 %vm3512_vm0, %v3513_v8 }
  0x33   :  { %3188 = vmatprep.subr.bf16.mxu0 %v3509_v1 }
  0x36   :  { %3190 = vmatpush3.bf16.msra.mxu0 %v3596_v30 }
  0x37   :  { %3197 = vmatprep.subr.bf16.mxu0 %v3509_v1 }
  0xf3   :  { %v331_v58 = vpop.f32.mrb[0].mxu1 }
  0xf4   :  { %v2905_v59 = vpop.f32.mrb[1].mxu1 }
  0xfc   :  { %v2894_v61 = vpop.f32.mrb[0].mxu0 }
  0xfd   :  { %v3624_v62 = vadd.f32 %v2894_v61, %v2714_v60  ;;  %v245_v63 = vpop.f32.mrb[1].mxu0 }
  0xfe   :  { %v3626_v0 = vadd.f32 %v2714_v60, %v245_v63 }
 0x100   :  { %v335_v2 = vadd.f32 %v331_v58, %v3626_v0 }
 0x102   :  { %3326 = vtanh.f32 %v335_v2  ;;  %v2718_v10 = vmul.f32 -1.442695, %v335_v2 }
 0x104   :  { %3328 = vpow2.f32 %v2718_v10  ;;  %v437_v39 = vpop.f32.mrb[2].mxu0 }
 0x105   :  { %v2916_v40 = vpop.f32.mrb[3].mxu0 }
 0x10c   :  { %v3327_v7 = vpop.eup %3326 }
 0x10d   :  { %352 = vrot.lane.b32.xlu0 %v3327_v7, %s3514_s26 }
 0x10e   :  { %v3329_v11 = vpop.eup %3328 }
 0x10f   :  { %v339_v12 = vadd.f32 1.0, %v3329_v11 }
 0x111   :  { %347 = vrot.lane.b32.xlu0 %v346_v9, %s3515_s27  ;;  %3330 = vrcp.f32 %v339_v12 }
 0x11b   :  { %v3331_v13 = vpop.eup %3330 }
 0x17f   :  { %v353_v14 = vpop.permute.xlu0 %352 }
 0x180   :  { %v355_v15 = vmul.f32 %v3331_v13, %v353_v14 }
 0x182   :  { %357 = vrot.lane.b32.xlu1 %v355_v15, %s3515_s27 }
 0x183   :  { %v348_v16 = vpop.permute.xlu0 %347 }
 0x184   :  { %v350_v17 = vmul.f32 %v3331_v13, %v348_v16 }
 0x1f4   :  { %v358_v19 = vpop.permute.xlu1 %357 }
 0x1f5   :  { %v3645_v20 = vadd.f32 %v358_v19, %v350_v17 }
 0x1f7   :  { %3332 = vtanh.f32 %v3645_v20  ;;  %v634_v9 = vrot.slane %v3645_v20, 6 }
 0x201   :  { %v3333_v35 = vpop.eup %3332 }
 0x202   :  { %363 = vrot.lane.b32.xlu1 %v3333_v35, %s3514_s26 }
 0x274   :  { %v364_v29 = vpop.permute.xlu1 %363 }
 0x275   :  { %v366_v38 = vmul.f32 %v3331_v13, %v364_v29 }
 0x277   :  { %442 = vrot.lane.b32.xlu0 %v366_v38, %s3515_s27 }
 0x2e9   :  { %v443_v41 = vpop.permute.xlu0 %442 }
 0x2ea   :  { %2926 = vmatmul.mubr.msk.f32.vlgmr.msra.gmra.mrb[2].mxu1 %vm174_vm2, %v443_v41  ;;  %2937 = vmatmul.mubr.msk.f32.vlgmr.msra.gmra.mrb[4].mxu0 %vm174_vm2, %v443_v41 }
 0x2eb   :  { %3193 = vmatpush3.bf16.msra.mxu1 %v3648_v24  ;;  %3199 = vmatpush3.bf16.msra.mxu0 %v3650_v28 }
 0x2ec   :  { %3194 = vmatprep.subr.bf16.mxu1 %v3509_v1  ;;  %3200 = vmatprep.subr.bf16.mxu0 %v3509_v1 }
 0x2ed   :  { %2947 = vmatprep.mubr.msk.f32.mxu1 %vm3512_vm0, %v3513_v8  ;;  %2958 = vmatprep.mubr.msk.f32.mxu0 %vm3512_vm0, %v3513_v8 }
 0x2ef   :  { %3196 = vmatpush3.bf16.msra.mxu1 %v3654_v34  ;;  %3202 = vmatpush3.bf16.msra.mxu0 %v3658_v36 }
 0x2f0   :  { %3203 = vmatprep.subr.bf16.mxu1 %v3509_v1  ;;  %3209 = vmatprep.subr.bf16.mxu0 %v3509_v1 }
 0x3bd   :  { %v512_v43 = vpop.f32.mrb[2].mxu1  ;;  %v618_v44 = vpop.f32.mrb[4].mxu0 }
 0x3be   :  { %v513_v45 = vadd.f32 %v512_v43, %v437_v39  ;;  %v623_v46 = vrot.slane %v618_v44, 6  ;;  %v2927_v47 = vpop.f32.mrb[3].mxu1  ;;  %v2938_v48 = vpop.f32.mrb[5].mxu0 }
 0x3c0   :  { %v522_v49 = vadd.f32 %v3693_v42, %v513_v45  ;;  %v625_v50 = vadd.f32 %v623_v46, %v3626_v0 }
 0x3c2   :  { %3334 = vtanh.f32 %v522_v49  ;;  %v2722_v55 = vmul.f32 -1.442695, %v522_v49  ;;  %v2724_v56 = vmul.f32 -1.442695, %v625_v50 }
 0x3c3   :  { %3336 = vtanh.f32 %v625_v50 }
 0x3c4   :  { %3338 = vpow2.f32 %v2722_v55 }
 0x3c5   :  { %3340 = vpow2.f32 %v2724_v56 }
 0x3cc   :  { %v3335_v52 = vpop.eup %3334 }
 0x3cd   :  { %v3337_v53 = vpop.eup %3336  ;;  %537 = vrot.lane.b32.xlu1 %v3335_v52, %s3514_s26 }
 0x3ce   :  { %638 = vrot.lane.b32.xlu0 %v3337_v53, %s3514_s26  ;;  %v3339_v57 = vpop.eup %3338 }
 0x3cf   :  { %v3341_v58 = vpop.eup %3340  ;;  %v526_v59 = vadd.f32 1.0, %v3339_v57 }
 0x3d0   :  { %v629_v60 = vadd.f32 1.0, %v3341_v58 }
 0x3d1   :  { %532 = vrot.lane.b32.xlu1 %v531_v54, %s3515_s27  ;;  %3342 = vrcp.f32 %v526_v59 }
 0x3d2   :  { %3344 = vrcp.f32 %v629_v60 }
 0x3db   :  { %v3343_v61 = vpop.eup %3342 }
 0x3dc   :  { %v3345_v2 = vpop.eup %3344 }
 0x3dd   :  { %v636_v11 = vmul.f32 %v3345_v2, %v634_v9 }
 0x43f   :  { %v538_v63 = vpop.permute.xlu1 %537 }
 0x440   :  { %v639_v5 = vpop.permute.xlu0 %638  ;;  %v540_v6 = vmul.f32 %v3343_v61, %v538_v63 }
 0x441   :  { %v641_v7 = vmul.f32 %v3345_v2, %v639_v5 }
 0x442   :  { %542 = vrot.lane.b32.xlu0 %v540_v6, %s3515_s27 }
 0x443   :  { %643 = vrot.lane.b32.xlu1 %v641_v7, %s3515_s27  ;;  %v533_v3 = vpop.permute.xlu1 %532 }
 0x444   :  { %v535_v10 = vmul.f32 %v3343_v61, %v533_v3 }
 0x4b4   :  { %v543_v12 = vpop.permute.xlu0 %542 }
 0x4b5   :  { %v644_v13 = vpop.permute.xlu1 %643  ;;  %v3706_v14 = vadd.f32 %v543_v12, %v535_v10 }
 0x4b6   :  { %v3708_v15 = vadd.f32 %v644_v13, %v636_v11 }
 0x4b7   :  { %3346 = vtanh.f32 %v3706_v14 }
 0x4b8   :  { %3348 = vtanh.f32 %v3708_v15  ;;  %v911_v59 = vrot.slane %v3708_v15, 6 }
 0x4c1   :  { %v3347_v16 = vpop.eup %3346 }
 0x4c2   :  { %v3349_v17 = vpop.eup %3348  ;;  %548 = vrot.lane.b32.xlu0 %v3347_v16, %s3514_s26 }
 0x4c3   :  { %649 = vrot.lane.b32.xlu1 %v3349_v17, %s3514_s26 }
 0x534   :  { %v549_v19 = vpop.permute.xlu0 %548 }
 0x535   :  { %v650_v20 = vpop.permute.xlu1 %649  ;;  %v551_v21 = vmul.f32 %v3343_v61, %v549_v19 }
 0x536   :  { %v652_v22 = vmul.f32 %v3345_v2, %v650_v20 }
 0x537   :  { %654 = vrot.lane.b32.xlu0 %v551_v21, %s3515_s27 }
 0x538   :  { %v729_v23 = vrot.slane %v652_v22, 2 }
 0x53a   :  { %730 = vrot.lane.b32.xlu1 %v729_v23, %s3515_s27 }
 0x5a9   :  { %v655_v25 = vpop.permute.xlu0 %654 }
 0x5aa   :  { %2948 = vmatmul.mubr.msk.f32.vlgmr.msra.gmra.mrb[4].mxu1 %vm174_vm2, %v655_v25 }
 0x5ab   :  { %3205 = vmatpush3.bf16.msra.mxu1 %v3579_v18  ;;  %2969 = vmatprep.mubr.msk.f32.mxu1 %vm3512_vm0, %v3513_v8 }
 0x5ac   :  { %v731_v26 = vpop.permute.xlu1 %730  ;;  %3206 = vmatprep.subr.bf16.mxu1 %v3509_v1 }
 0x5ad   :  { %2959 = vmatmul.mubr.msk.f32.vlgmr.msra.gmra.mrb[6].mxu0 %vm174_vm2, %v731_v26 }
 0x5ae   :  { %3211 = vmatpush3.bf16.msra.mxu0 %v3648_v24  ;;  %2980 = vmatprep.mubr.msk.f32.mxu0 %vm3512_vm0, %v3513_v8 }
 0x5af   :  { %3208 = vmatpush3.bf16.msra.mxu1 %v3596_v30  ;;  %3212 = vmatprep.subr.bf16.mxu0 %v3509_v1 }
 0x5b0   :  { %3215 = vmatprep.subr.bf16.mxu1 %v3509_v1 }
 0x5b2   :  { %2970 = vmatmul.mubr.msk.f32.vlgmr.msra.gmra.mrb[6].mxu1 %vm174_vm2, %v731_v26  ;;  %3214 = vmatpush3.bf16.msra.mxu0 %v3654_v34 }
 0x5b3   :  { %3221 = vmatprep.subr.bf16.mxu0 %v3509_v1  ;;  %3217 = vmatpush3.bf16.msra.mxu1 %v3650_v28 }
 0x5b4   :  { %3218 = vmatprep.subr.bf16.mxu1 %v3509_v1  ;;  %2991 = vmatprep.mubr.msk.f32.mxu1 %vm3512_vm0, %v3513_v8 }
 0x5b7   :  { %3220 = vmatpush3.bf16.msra.mxu1 %v3658_v36 }
 0x5b8   :  { %3227 = vmatprep.subr.bf16.mxu1 %v3509_v1 }
 0x67d   :  { %v724_v27 = vpop.f32.mrb[4].mxu1 }
 0x67e   :  { %v2949_v31 = vpop.f32.mrb[5].mxu1 }
 0x680   :  { %v800_v32 = vpop.f32.mrb[6].mxu0 }
 0x681   :  { %v801_v33 = vadd.f32 %v800_v32, %v724_v27  ;;  %v2960_v37 = vpop.f32.mrb[7].mxu0 }
 0x683   :  { %v804_v35 = vadd.f32 %v3693_v42, %v801_v33 }
 0x685   :  { %3350 = vtanh.f32 %v804_v35  ;;  %v895_v29 = vpop.f32.mrb[6].mxu1  ;;  %v2727_v44 = vmul.f32 -1.442695, %v804_v35 }
 0x686   :  { %v900_v38 = vrot.slane %v895_v29, 4  ;;  %v2971_v39 = vpop.f32.mrb[7].mxu1 }
 0x688   :  { %v902_v40 = vadd.f32 %v900_v38, %v3626_v0 }
 0x68a   :  { %3352 = vtanh.f32 %v902_v40  ;;  %v2729_v45 = vmul.f32 -1.442695, %v902_v40 }
 0x68b   :  { %3354 = vpow2.f32 %v2727_v44 }
 0x68c   :  { %3356 = vpow2.f32 %v2729_v45 }
 0x68f   :  { %v3351_v41 = vpop.eup %3350 }
 0x690   :  { %814 = vrot.lane.b32.xlu0 %v3351_v41, %s3514_s26 }
 0x694   :  { %v3353_v43 = vpop.eup %3352 }
 0x695   :  { %915 = vrot.lane.b32.xlu1 %v3353_v43, %s3514_s26  ;;  %v3355_v46 = vpop.eup %3354 }
 0x696   :  { %v808_v47 = vadd.f32 1.0, %v3355_v46  ;;  %v3357_v48 = vpop.eup %3356 }
 0x697   :  { %v906_v49 = vadd.f32 1.0, %v3357_v48 }
 0x698   :  { %3358 = vrcp.f32 %v808_v47 }
 0x699   :  { %3360 = vrcp.f32 %v906_v49 }
 0x6a2   :  { %v3359_v50 = vpop.eup %3358 }
 0x6a3   :  { %v3361_v53 = vpop.eup %3360  ;;  %v812_v56 = vmul.f32 %v3359_v50, %v3706_v14 }
 0x6a4   :  { %v913_v60 = vmul.f32 %v3361_v53, %v911_v59 }
 0x702   :  { %v815_v51 = vpop.permute.xlu0 %814 }
 0x703   :  { %v817_v52 = vmul.f32 %v3359_v50, %v815_v51 }
 0x705   :  { %819 = vrot.lane.b32.xlu0 %v817_v52, %s3515_s27 }
 0x707   :  { %v916_v54 = vpop.permute.xlu1 %915 }
 0x708   :  { %v918_v55 = vmul.f32 %v3361_v53, %v916_v54 }
 0x70a   :  { %920 = vrot.lane.b32.xlu1 %v918_v55, %s3515_s27 }
 0x777   :  { %v820_v57 = vpop.permute.xlu0 %819 }
 0x778   :  { %v3744_v58 = vadd.f32 %v820_v57, %v812_v56 }
 0x77a   :  { %3362 = vtanh.f32 %v3744_v58 }
 0x77c   :  { %v921_v61 = vpop.permute.xlu1 %920 }
 0x77d   :  { %v3748_v63 = vadd.f32 %v921_v61, %v913_v60 }
 0x77f   :  { %3364 = vtanh.f32 %v3748_v63  ;;  %v1188_v43 = vrot.slane %v3748_v63, 6 }
 0x784   :  { %v3363_v2 = vpop.eup %3362 }
 0x785   :  { %825 = vrot.lane.b32.xlu0 %v3363_v2, %s3514_s26 }
 0x789   :  { %v3365_v5 = vpop.eup %3364 }
 0x78a   :  { %926 = vrot.lane.b32.xlu1 %v3365_v5, %s3514_s26 }
 0x7f7   :  { %v826_v6 = vpop.permute.xlu0 %825 }
 0x7f8   :  { %v828_v7 = vmul.f32 %v3359_v50, %v826_v6 }
 0x7fa   :  { %931 = vrot.lane.b32.xlu0 %v828_v7, %s3515_s27 }
 0x7fc   :  { %v927_v3 = vpop.permute.xlu1 %926 }
 0x7fd   :  { %v929_v9 = vmul.f32 %v3361_v53, %v927_v3 }
 0x7ff   :  { %v1006_v10 = vrot.slane %v929_v9, 4 }
 0x801   :  { %1007 = vrot.lane.b32.xlu1 %v1006_v10, %s3515_s27 }
 0x86c   :  { %v932_v11 = vpop.permute.xlu0 %931 }
 0x86d   :  { %2981 = vmatmul.mubr.msk.f32.vlgmr.msra.gmra.mrb[8].mxu0 %vm174_vm2, %v932_v11 }
 0x86e   :  { %3223 = vmatpush3.bf16.msra.mxu0 %v3579_v18  ;;  %3002 = vmatprep.mubr.msk.f32.mxu0 %vm3512_vm0, %v3513_v8 }
 0x86f   :  { %3224 = vmatprep.subr.bf16.mxu0 %v3509_v1 }
 0x872   :  { %3226 = vmatpush3.bf16.msra.mxu0 %v3596_v30 }
 0x873   :  { %v1008_v12 = vpop.permute.xlu1 %1007  ;;  %3233 = vmatprep.subr.bf16.mxu0 %v3509_v1 }
 0x874   :  { %2992 = vmatmul.mubr.msk.f32.vlgmr.msra.gmra.mrb[8].mxu1 %vm174_vm2, %v1008_v12 }
 0x875   :  { %3003 = vmatmul.mubr.msk.f32.vlgmr.msra.gmra.mrb[10].mxu0 %vm174_vm2, %v1008_v12  ;;  %3229 = vmatpush3.bf16.msra.mxu1 %v3648_v24 }
 0x876   :  { %3230 = vmatprep.subr.bf16.mxu1 %v3509_v1  ;;  %3235 = vmatpush3.bf16.msra.mxu0 %v3650_v28 }
 0x877   :  { %3236 = vmatprep.subr.bf16.mxu0 %v3509_v1  ;;  %3013 = vmatprep.mubr.msk.f32.mxu1 %vm3512_vm0, %v3513_v8 }
 0x878   :  { %3024 = vmatprep.mubr.msk.f32.mxu0 %vm3512_vm0, %v3513_v8 }
 0x879   :  { %3232 = vmatpush3.bf16.msra.mxu1 %v3654_v34 }
 0x87a   :  { %3238 = vmatpush3.bf16.msra.mxu0 %v3658_v36  ;;  %3239 = vmatprep.subr.bf16.mxu1 %v3509_v1 }
 0x87b   :  { %3245 = vmatprep.subr.bf16.mxu0 %v3509_v1 }
 0x940   :  { %v1001_v13 = vpop.f32.mrb[8].mxu0 }
 0x941   :  { %v2982_v14 = vpop.f32.mrb[9].mxu0 }
 0x947   :  { %v1077_v15 = vpop.f32.mrb[8].mxu1 }
 0x948   :  { %v1078_v16 = vadd.f32 %v1077_v15, %v1001_v13  ;;  %v1172_v17 = vpop.f32.mrb[10].mxu0  ;;  %v2993_v19 = vpop.f32.mrb[9].mxu1 }
 0x949   :  { %v1177_v20 = vrot.slane %v1172_v17, 2  ;;  %v3004_v21 = vpop.f32.mrb[11].mxu0 }
 0x94a   :  { %v1081_v22 = vadd.f32 %v3693_v42, %v1078_v16 }
 0x94b   :  { %v1179_v23 = vadd.f32 %v1177_v20, %v3626_v0 }
 0x94c   :  { %3366 = vtanh.f32 %v1081_v22  ;;  %v2732_v27 = vmul.f32 -1.442695, %v1081_v22 }
 0x94d   :  { %3368 = vtanh.f32 %v1179_v23  ;;  %v2734_v31 = vmul.f32 -1.442695, %v1179_v23 }
 0x94e   :  { %3370 = vpow2.f32 %v2732_v27 }
 0x94f   :  { %3372 = vpow2.f32 %v2734_v31 }
 0x956   :  { %v3367_v25 = vpop.eup %3366 }
 0x957   :  { %v3369_v26 = vpop.eup %3368  ;;  %1091 = vrot.lane.b32.xlu1 %v3367_v25, %s3514_s26 }
 0x958   :  { %1192 = vrot.lane.b32.xlu0 %v3369_v26, %s3514_s26  ;;  %v3371_v32 = vpop.eup %3370 }
 0x959   :  { %v3373_v33 = vpop.eup %3372  ;;  %v1085_v37 = vadd.f32 1.0, %v3371_v32 }
 0x95a   :  { %v1183_v35 = vadd.f32 1.0, %v3373_v33 }
 0x95b   :  { %3374 = vrcp.f32 %v1085_v37 }
 0x95c   :  { %3376 = vrcp.f32 %v1183_v35 }
 0x965   :  { %v3375_v29 = vpop.eup %3374 }
 0x966   :  { %v3377_v38 = vpop.eup %3376  ;;  %v1089_v44 = vmul.f32 %v3375_v29, %v3744_v58 }
 0x967   :  { %v1190_v45 = vmul.f32 %v3377_v38, %v1188_v43 }
 0x9c9   :  { %v1092_v0 = vpop.permute.xlu1 %1091 }
 0x9ca   :  { %v1193_v39 = vpop.permute.xlu0 %1192  ;;  %v1094_v40 = vmul.f32 %v3375_v29, %v1092_v0 }
 0x9cb   :  { %v1195_v41 = vmul.f32 %v3377_v38, %v1193_v39 }
 0x9cc   :  { %1096 = vrot.lane.b32.xlu1 %v1094_v40, %s3515_s27 }
 0x9cd   :  { %1197 = vrot.lane.b32.xlu0 %v1195_v41, %s3515_s27 }
 0xa3e   :  { %v1097_v46 = vpop.permute.xlu1 %1096 }
 0xa3f   :  { %v1198_v47 = vpop.permute.xlu0 %1197  ;;  %v3784_v48 = vadd.f32 %v1097_v46, %v1089_v44 }
 0xa40   :  { %v3786_v49 = vadd.f32 %v1198_v47, %v1190_v45 }
 0xa41   :  { %3378 = vtanh.f32 %v3784_v48 }
 0xa42   :  { %3380 = vtanh.f32 %v3786_v49  ;;  %v1462_v26 = vrot.slane %v3786_v49, 6 }
 0xa4b   :  { %v3379_v50 = vpop.eup %3378 }
 0xa4c   :  { %v3381_v51 = vpop.eup %3380  ;;  %1102 = vrot.lane.b32.xlu1 %v3379_v50, %s3514_s26 }
 0xa4d   :  { %1203 = vrot.lane.b32.xlu0 %v3381_v51, %s3514_s26 }
 0xabe   :  { %v1103_v52 = vpop.permute.xlu1 %1102 }
 0xabf   :  { %v1204_v53 = vpop.permute.xlu0 %1203  ;;  %v1105_v54 = vmul.f32 %v3375_v29, %v1103_v52 }
 0xac0   :  { %v1206_v55 = vmul.f32 %v3377_v38, %v1204_v53 }
 0xac1   :  { %1208 = vrot.lane.b32.xlu0 %v1105_v54, %s3515_s27 }
 0xac2   :  { %v1283_v56 = vrot.slane %v1206_v55, 6 }
 0xac4   :  { %1284 = vrot.lane.b32.xlu1 %v1283_v56, %s3515_s27 }
 0xb33   :  { %v1209_v57 = vpop.permute.xlu0 %1208 }
 0xb34   :  { %3014 = vmatmul.mubr.msk.f32.vlgmr.msra.gmra.mrb[10].mxu1 %vm174_vm2, %v1209_v57 }
 0xb35   :  { %3241 = vmatpush3.bf16.msra.mxu1 %v3579_v18  ;;  %3035 = vmatprep.mubr.msk.f32.mxu1 %vm3512_vm0, %v3513_v8 }
 0xb36   :  { %v1285_v58 = vpop.permute.xlu1 %1284  ;;  %3242 = vmatprep.subr.bf16.mxu1 %v3509_v1 }
 0xb37   :  { %3025 = vmatmul.mubr.msk.f32.vlgmr.msra.gmra.mrb[12].mxu0 %vm174_vm2, %v1285_v58 }
 0xb38   :  { %3247 = vmatpush3.bf16.msra.mxu0 %v3648_v24  ;;  %3046 = vmatprep.mubr.msk.f32.mxu0 %vm3512_vm0, %v3513_v8 }
 0xb39   :  { %3244 = vmatpush3.bf16.msra.mxu1 %v3596_v30  ;;  %3248 = vmatprep.subr.bf16.mxu0 %v3509_v1 }
 0xb3a   :  { %3251 = vmatprep.subr.bf16.mxu1 %v3509_v1 }
 0xb3c   :  { %3036 = vmatmul.mubr.msk.f32.vlgmr.msra.gmra.mrb[12].mxu1 %vm174_vm2, %v1285_v58  ;;  %3250 = vmatpush3.bf16.msra.mxu0 %v3654_v34 }
 0xb3d   :  { %3253 = vmatpush3.bf16.msra.mxu1 %v3650_v28  ;;  %3257 = vmatprep.subr.bf16.mxu0 %v3509_v1 }
 0xb3e   :  { %3254 = vmatprep.subr.bf16.mxu1 %v3509_v1  ;;  %3057 = vmatprep.mubr.msk.f32.mxu1 %vm3512_vm0, %v3513_v8 }
 0xb41   :  { %3256 = vmatpush3.bf16.msra.mxu1 %v3658_v36 }
 0xb42   :  { %3263 = vmatprep.subr.bf16.mxu1 %v3509_v1 }
 0xc07   :  { %v1278_v59 = vpop.f32.mrb[10].mxu1 }
 0xc08   :  { %v3015_v60 = vpop.f32.mrb[11].mxu1 }
 0xc0a   :  { %v1354_v61 = vpop.f32.mrb[12].mxu0 }
 0xc0b   :  { %v1355_v63 = vadd.f32 %v1354_v61, %v1278_v59  ;;  %v3026_v2 = vpop.f32.mrb[13].mxu0 }
 0xc0d   :  { %v1358_v5 = vadd.f32 %v3693_v42, %v1355_v63 }
 0xc0f   :  { %3382 = vtanh.f32 %v1358_v5  ;;  %v1449_v6 = vpop.f32.mrb[12].mxu1  ;;  %v2737_v11 = vmul.f32 -1.442695, %v1358_v5 }
 0xc10   :  { %v1453_v7 = vadd.f32 %v1449_v6, %v3624_v62  ;;  %v3037_v3 = vpop.f32.mrb[13].mxu1 }
 0xc12   :  { %3384 = vtanh.f32 %v1453_v7  ;;  %v2739_v12 = vmul.f32 -1.442695, %v1453_v7 }
 0xc13   :  { %3386 = vpow2.f32 %v2737_v11 }
 0xc14   :  { %3388 = vpow2.f32 %v2739_v12 }
 0xc19   :  { %v3383_v9 = vpop.eup %3382 }
 0xc1a   :  { %1368 = vrot.lane.b32.xlu0 %v3383_v9, %s3514_s26 }
 0xc1c   :  { %v3385_v10 = vpop.eup %3384 }
 0xc1d   :  { %1466 = vrot.lane.b32.xlu1 %v3385_v10, %s3514_s26  ;;  %v3387_v13 = vpop.eup %3386 }
 0xc1e   :  { %v3389_v14 = vpop.eup %3388  ;;  %v1362_v15 = vadd.f32 1.0, %v3387_v13 }
 0xc1f   :  { %v1457_v16 = vadd.f32 1.0, %v3389_v14 }
 0xc20   :  { %3390 = vrcp.f32 %v1362_v15 }
 0xc21   :  { %3392 = vrcp.f32 %v1457_v16 }
 0xc2a   :  { %v3391_v17 = vpop.eup %3390 }
 0xc2b   :  { %v3393_v21 = vpop.eup %3392  ;;  %v1366_v25 = vmul.f32 %v3391_v17, %v3784_v48 }
 0xc2c   :  { %v1464_v32 = vmul.f32 %v3393_v21, %v1462_v26 }
 0xc8c   :  { %v1369_v19 = vpop.permute.xlu0 %1368 }
 0xc8d   :  { %v1371_v20 = vmul.f32 %v3391_v17, %v1369_v19 }
 0xc8f   :  { %1373 = vrot.lane.b32.xlu0 %v1371_v20, %s3515_s27  ;;  %v1467_v22 = vpop.permute.xlu1 %1466 }
 0xc90   :  { %v1469_v23 = vmul.f32 %v3393_v21, %v1467_v22 }
 0xc92   :  { %1471 = vrot.lane.b32.xlu1 %v1469_v23, %s3515_s27 }
 0xd01   :  { %v1374_v27 = vpop.permute.xlu0 %1373 }
 0xd02   :  { %v3823_v31 = vadd.f32 %v1374_v27, %v1366_v25 }
 0xd04   :  { %3394 = vtanh.f32 %v3823_v31  ;;  %v1472_v33 = vpop.permute.xlu1 %1471 }
 0xd05   :  { %v3826_v37 = vadd.f32 %v1472_v33, %v1464_v32 }
 0xd07   :  { %3396 = vtanh.f32 %v3826_v37  ;;  %v1738_v12 = vrot.slane %v3826_v37, 6 }
 0xd0e   :  { %v3395_v35 = vpop.eup %3394 }
 0xd0f   :  { %1379 = vrot.lane.b32.xlu0 %v3395_v35, %s3514_s26 }
 0xd11   :  { %v3397_v29 = vpop.eup %3396 }
 0xd12   :  { %1477 = vrot.lane.b32.xlu1 %v3397_v29, %s3514_s26 }
 0xd81   :  { %v1380_v0 = vpop.permute.xlu0 %1379 }
 0xd82   :  { %v1382_v38 = vmul.f32 %v3391_v17, %v1380_v0 }
 0xd84   :  { %1482 = vrot.lane.b32.xlu0 %v1382_v38, %s3515_s27  ;;  %v1478_v39 = vpop.permute.xlu1 %1477 }
 0xd85   :  { %v1480_v40 = vmul.f32 %v3393_v21, %v1478_v39 }
 0xd87   :  { %1557 = vrot.lane.b32.xlu1 %v1480_v40, %s3515_s27 }
 0xdf6   :  { %v1483_v41 = vpop.permute.xlu0 %1482 }
 0xdf7   :  { %3047 = vmatmul.mubr.msk.f32.vlgmr.msra.gmra.mrb[14].mxu0 %vm174_vm2, %v1483_v41 }
 0xdf8   :  { %3259 = vmatpush3.bf16.msra.mxu0 %v3579_v18  ;;  %3068 = vmatprep.mubr.msk.f32.mxu0 %vm3512_vm0, %v3513_v8 }
 0xdf9   :  { %v1558_v43 = vpop.permute.xlu1 %1557  ;;  %3260 = vmatprep.subr.bf16.mxu0 %v3509_v1 }
 0xdfa   :  { %3058 = vmatmul.mubr.msk.f32.vlgmr.msra.gmra.mrb[14].mxu1 %vm174_vm2, %v1558_v43 }
 0xdfb   :  { %3265 = vmatpush3.bf16.msra.mxu1 %v3648_v24  ;;  %3079 = vmatprep.mubr.msk.f32.mxu1 %vm3512_vm0, %v3513_v8 }
 0xdfc   :  { %3262 = vmatpush3.bf16.msra.mxu0 %v3596_v30  ;;  %3266 = vmatprep.subr.bf16.mxu1 %v3509_v1 }
 0xdfd   :  { %3269 = vmatprep.subr.bf16.mxu0 %v3509_v1 }
 0xdff   :  { %3069 = vmatmul.mubr.msk.f32.vlgmr.msra.gmra.mrb[16].mxu0 %vm174_vm2, %v1558_v43  ;;  %3268 = vmatpush3.bf16.msra.mxu1 %v3654_v34 }
 0xe00   :  { %3271 = vmatpush3.bf16.msra.mxu0 %v3650_v28  ;;  %3275 = vmatprep.subr.bf16.mxu1 %v3509_v1 }
 0xe01   :  { %3272 = vmatprep.subr.bf16.mxu0 %v3509_v1  ;;  %3090 = vmatprep.mubr.msk.f32.mxu0 %vm3512_vm0, %v3513_v8 }
 0xe04   :  { %3274 = vmatpush3.bf16.msra.mxu0 %v3658_v36 }
 0xe05   :  { %3281 = vmatprep.subr.bf16.mxu0 %v3509_v1 }
 0xeca   :  { %v1552_v44 = vpop.f32.mrb[14].mxu0 }
 0xecb   :  { %v3048_v45 = vpop.f32.mrb[15].mxu0 }
 0xecd   :  { %v1627_v46 = vpop.f32.mrb[14].mxu1 }
 0xece   :  { %v1628_v47 = vadd.f32 %v1627_v46, %v1552_v44  ;;  %v3059_v48 = vpop.f32.mrb[15].mxu1 }
 0xed0   :  { %v1631_v49 = vadd.f32 %v3693_v42, %v1628_v47 }
 0xed2   :  { %3398 = vtanh.f32 %v1631_v49  ;;  %v1722_v50 = vpop.f32.mrb[16].mxu0  ;;  %v2742_v56 = vmul.f32 -1.442695, %v1631_v49 }
 0xed3   :  { %v1727_v51 = vrot.slane %v1722_v50, 6  ;;  %v3070_v52 = vpop.f32.mrb[17].mxu0 }
 0xed5   :  { %v1729_v53 = vadd.f32 %v1727_v51, %v3624_v62 }
 0xed7   :  { %3400 = vtanh.f32 %v1729_v53  ;;  %v2744_v57 = vmul.f32 -1.442695, %v1729_v53 }
 0xed8   :  { %3402 = vpow2.f32 %v2742_v56 }
 0xed9   :  { %3404 = vpow2.f32 %v2744_v57 }
 0xedc   :  { %v3399_v54 = vpop.eup %3398 }
 0xedd   :  { %1641 = vrot.lane.b32.xlu0 %v3399_v54, %s3514_s26 }
 0xee1   :  { %v3401_v55 = vpop.eup %3400 }
 0xee2   :  { %1742 = vrot.lane.b32.xlu1 %v3401_v55, %s3514_s26  ;;  %v3403_v58 = vpop.eup %3402 }
 0xee3   :  { %v1635_v59 = vadd.f32 1.0, %v3403_v58  ;;  %v3405_v60 = vpop.eup %3404 }
 0xee4   :  { %v1733_v61 = vadd.f32 1.0, %v3405_v60 }
 0xee5   :  { %3406 = vrcp.f32 %v1635_v59 }
 0xee6   :  { %3408 = vrcp.f32 %v1733_v61 }
 0xeef   :  { %v3407_v63 = vpop.eup %3406 }
 0xef0   :  { %v3409_v6 = vpop.eup %3408  ;;  %v1639_v9 = vmul.f32 %v3407_v63, %v3823_v31 }
 0xef1   :  { %v1740_v13 = vmul.f32 %v3409_v6, %v1738_v12 }
 0xf4f   :  { %v1642_v2 = vpop.permute.xlu0 %1641 }
 0xf50   :  { %v1644_v5 = vmul.f32 %v3407_v63, %v1642_v2 }
 0xf52   :  { %1646 = vrot.lane.b32.xlu0 %v1644_v5, %s3515_s27 }
 0xf54   :  { %v1743_v7 = vpop.permute.xlu1 %1742 }
 0xf55   :  { %v1745_v3 = vmul.f32 %v3409_v6, %v1743_v7 }
 0xf57   :  { %1747 = vrot.lane.b32.xlu1 %v1745_v3, %s3515_s27 }
 0xfc4   :  { %v1647_v10 = vpop.permute.xlu0 %1646 }
 0xfc5   :  { %v3861_v11 = vadd.f32 %v1647_v10, %v1639_v9 }
 0xfc7   :  { %3410 = vtanh.f32 %v3861_v11 }
 0xfc9   :  { %v1748_v14 = vpop.permute.xlu1 %1747 }
 0xfca   :  { %v3865_v15 = vadd.f32 %v1748_v14, %v1740_v13 }
 0xfcc   :  { %3412 = vtanh.f32 %v3865_v15  ;;  %v2015_v55 = vrot.slane %v3865_v15, 6 }
 0xfd1   :  { %v3411_v16 = vpop.eup %3410 }
 0xfd2   :  { %1652 = vrot.lane.b32.xlu0 %v3411_v16, %s3514_s26 }
 0xfd6   :  { %v3413_v17 = vpop.eup %3412 }
 0xfd7   :  { %1753 = vrot.lane.b32.xlu1 %v3413_v17, %s3514_s26 }
0x1044   :  { %v1653_v19 = vpop.permute.xlu0 %1652 }
0x1045   :  { %v1655_v20 = vmul.f32 %v3407_v63, %v1653_v19 }
0x1047   :  { %1758 = vrot.lane.b32.xlu0 %v1655_v20, %s3515_s27 }
0x1049   :  { %v1754_v21 = vpop.permute.xlu1 %1753 }
0x104a   :  { %v1756_v22 = vmul.f32 %v3409_v6, %v1754_v21 }
0x104c   :  { %v1833_v23 = vrot.slane %v1756_v22, 2 }
0x104e   :  { %1834 = vrot.lane.b32.xlu1 %v1833_v23, %s3515_s27 }
0x10b9   :  { %v1759_v25 = vpop.permute.xlu0 %1758 }
0x10ba   :  { %3080 = vmatmul.mubr.msk.f32.vlgmr.msra.gmra.mrb[16].mxu1 %vm174_vm2, %v1759_v25 }
0x10bb   :  { %3277 = vmatpush3.bf16.msra.mxu1 %v3579_v18  ;;  %3101 = vmatprep.mubr.msk.f32.mxu1 %vm3512_vm0, %v3513_v8 }
0x10bc   :  { %3278 = vmatprep.subr.bf16.mxu1 %v3509_v1 }
0x10bf   :  { %3280 = vmatpush3.bf16.msra.mxu1 %v3596_v30 }
0x10c0   :  { %v1835_v26 = vpop.permute.xlu1 %1834  ;;  %3287 = vmatprep.subr.bf16.mxu1 %v3509_v1 }
0x10c1   :  { %3091 = vmatmul.mubr.msk.f32.vlgmr.msra.gmra.mrb[18].mxu0 %vm174_vm2, %v1835_v26 }
0x10c2   :  { %3102 = vmatmul.mubr.msk.f32.vlgmr.msra.gmra.mrb[18].mxu1 %vm174_vm2, %v1835_v26  ;;  %3283 = vmatpush3.bf16.msra.mxu0 %v3648_v24 }
0x10c3   :  { %3284 = vmatprep.subr.bf16.mxu0 %v3509_v1  ;;  %3289 = vmatpush3.bf16.msra.mxu1 %v3650_v28 }
0x10c4   :  { %3112 = vmatprep.mubr.msk.f32.mxu0 %vm3512_vm0, %v3513_v8  ;;  %3290 = vmatprep.subr.bf16.mxu1 %v3509_v1 }
0x10c5   :  { %3123 = vmatprep.mubr.msk.f32.mxu1 %vm3512_vm0, %v3513_v8 }
0x10c6   :  { %3286 = vmatpush3.bf16.msra.mxu0 %v3654_v34 }
0x10c7   :  { %3293 = vmatprep.subr.bf16.mxu0 %v3509_v1  ;;  %3292 = vmatpush3.bf16.msra.mxu1 %v3658_v36 }
0x10c8   :  { %3299 = vmatprep.subr.bf16.mxu1 %v3509_v1 }
0x118d   :  { %v1828_v27 = vpop.f32.mrb[16].mxu1 }
0x118e   :  { %v3081_v31 = vpop.f32.mrb[17].mxu1 }
0x1194   :  { %v1904_v32 = vpop.f32.mrb[18].mxu0 }
0x1195   :  { %v1905_v33 = vadd.f32 %v1904_v32, %v1828_v27  ;;  %v3092_v37 = vpop.f32.mrb[19].mxu0  ;;  %v1999_v35 = vpop.f32.mrb[18].mxu1 }
0x1196   :  { %v2004_v29 = vrot.slane %v1999_v35, 4  ;;  %v3103_v0 = vpop.f32.mrb[19].mxu1 }
0x1197   :  { %v1908_v38 = vadd.f32 %v3693_v42, %v1905_v33 }
0x1198   :  { %v2006_v39 = vadd.f32 %v2004_v29, %v3624_v62 }
0x1199   :  { %3414 = vtanh.f32 %v1908_v38  ;;  %v2747_v43 = vmul.f32 -1.442695, %v1908_v38 }
0x119a   :  { %3416 = vtanh.f32 %v2006_v39  ;;  %v2749_v44 = vmul.f32 -1.442695, %v2006_v39 }
0x119b   :  { %3418 = vpow2.f32 %v2747_v43 }
0x119c   :  { %3420 = vpow2.f32 %v2749_v44 }
0x11a3   :  { %v3415_v40 = vpop.eup %3414 }
0x11a4   :  { %v3417_v41 = vpop.eup %3416  ;;  %1918 = vrot.lane.b32.xlu0 %v3415_v40, %s3514_s26 }
0x11a5   :  { %2019 = vrot.lane.b32.xlu1 %v3417_v41, %s3514_s26  ;;  %v3419_v45 = vpop.eup %3418 }
0x11a6   :  { %v3421_v46 = vpop.eup %3420  ;;  %v1912_v47 = vadd.f32 1.0, %v3419_v45 }
0x11a7   :  { %v2010_v48 = vadd.f32 1.0, %v3421_v46 }
0x11a8   :  { %3422 = vrcp.f32 %v1912_v47 }
0x11a9   :  { %3424 = vrcp.f32 %v2010_v48 }
0x11b2   :  { %v3423_v49 = vpop.eup %3422 }
0x11b3   :  { %v3425_v51 = vpop.eup %3424  ;;  %v1916_v56 = vmul.f32 %v3423_v49, %v3861_v11 }
0x11b4   :  { %v2017_v58 = vmul.f32 %v3425_v51, %v2015_v55 }
0x1216   :  { %v1919_v50 = vpop.permute.xlu0 %1918 }
0x1217   :  { %v1921_v52 = vmul.f32 %v3423_v49, %v1919_v50  ;;  %v2020_v53 = vpop.permute.xlu1 %2019 }
0x1218   :  { %v2022_v54 = vmul.f32 %v3425_v51, %v2020_v53 }
0x1219   :  { %1923 = vrot.lane.b32.xlu0 %v1921_v52, %s3515_s27 }
0x121a   :  { %2024 = vrot.lane.b32.xlu1 %v2022_v54, %s3515_s27 }
0x128b   :  { %v1924_v57 = vpop.permute.xlu0 %1923 }
0x128c   :  { %v3901_v59 = vadd.f32 %v1924_v57, %v1916_v56  ;;  %v2025_v60 = vpop.permute.xlu1 %2024 }
0x128d   :  { %v3903_v61 = vadd.f32 %v2025_v60, %v2017_v58 }
0x128e   :  { %3426 = vtanh.f32 %v3901_v59 }
0x128f   :  { %3428 = vtanh.f32 %v3903_v61  ;;  %v2292_v35 = vrot.slane %v3903_v61, 6 }
0x1298   :  { %v3427_v63 = vpop.eup %3426 }
0x1299   :  { %v3429_v2 = vpop.eup %3428  ;;  %1929 = vrot.lane.b32.xlu0 %v3427_v63, %s3514_s26  ;;  %v3516_v63 = vmov 1966171168  }
0x129a   :  { %2030 = vrot.lane.b32.xlu1 %v3429_v2, %s3514_s26  ;;  %v2489_v2 = vunpack.c.l.s4 %v3516_v63 }
0x130b   :  { %v1930_v5 = vpop.permute.xlu0 %1929 }
0x130c   :  { %v1932_v6 = vmul.f32 %v3423_v49, %v1930_v5  ;;  %v2031_v7 = vpop.permute.xlu1 %2030  ;;  %v2490_v5 = vunpack.c.0.s8 %v2489_v2 }
0x130d   :  { %v2033_v3 = vmul.f32 %v3425_v51, %v2031_v7 }
0x130e   :  { %2035 = vrot.lane.b32.xlu0 %v1932_v6, %s3515_s27  ;;  %v3948_v6 = vsub.s32 %v2490_v5, %v3574_v4 }
0x130f   :  { %v2110_v9 = vrot.slane %v2033_v3, 4 }
0x1311   :  { %2111 = vrot.lane.b32.xlu1 %v2110_v9, %s3515_s27 }
0x1380   :  { %v2036_v10 = vpop.permute.xlu0 %2035 }
0x1381   :  { %3113 = vmatmul.mubr.msk.f32.vlgmr.msra.gmra.mrb[20].mxu0 %vm174_vm2, %v2036_v10 }
0x1382   :  { %3295 = vmatpush3.bf16.msra.mxu0 %v3579_v18  ;;  %3134 = vmatprep.mubr.msk.f32.mxu0 %vm3512_vm0, %v3513_v8 }
0x1383   :  { %v2112_v11 = vpop.permute.xlu1 %2111  ;;  %3296 = vmatprep.subr.bf16.mxu0 %v3509_v1 }
0x1384   :  { %3124 = vmatmul.mubr.msk.f32.vlgmr.msra.gmra.mrb[20].mxu1 %vm174_vm2, %v2112_v11 }
0x1385   :  { %3301 = vmatpush3.bf16.msra.mxu1 %v3648_v24  ;;  %3145 = vmatprep.mubr.msk.f32.mxu1 %vm3512_vm0, %v3513_v8 }
0x1386   :  { %3298 = vmatpush3.bf16.msra.mxu0 %v3596_v30  ;;  %3302 = vmatprep.subr.bf16.mxu1 %v3509_v1 }
0x1387   :  { %3305 = vmatprep.subr.bf16.mxu0 %v3509_v1 }
0x1389   :  { %3135 = vmatmul.mubr.msk.f32.vlgmr.msra.gmra.mrb[22].mxu0 %vm174_vm2, %v2112_v11  ;;  %3304 = vmatpush3.bf16.msra.mxu1 %v3654_v34 }
0x138a   :  { %3307 = vmatpush3.bf16.msra.mxu0 %v3650_v28  ;;  %3156 = vmatprep.mubr.msk.f32.mxu0 %vm3512_vm0, %v3513_v8 }
0x138b   :  { %3308 = vmatprep.subr.bf16.mxu0 %v3509_v1 }
0x138e   :  { %3310 = vmatpush3.bf16.msra.mxu0 %v3658_v36 }
0x1454   :  { %v2105_v18 = vpop.f32.mrb[20].mxu0 }
0x1455   :  { %v3114_v24 = vpop.f32.mrb[21].mxu0 }
0x1457   :  { %v2181_v30 = vpop.f32.mrb[20].mxu1 }
0x1458   :  { %v2182_v12 = vadd.f32 %v2181_v30, %v2105_v18  ;;  %v3125_v13 = vpop.f32.mrb[21].mxu1  ;;  %v2539_v30 = vsub.s32 0, %v3574_v4 }
0x145a   :  { %v2185_v14 = vadd.f32 %v3693_v42, %v2182_v12 }
0x145c   :  { %3430 = vtanh.f32 %v2185_v14  ;;  %v2276_v15 = vpop.f32.mrb[22].mxu0  ;;  %v2752_v8 = vmul.f32 -1.442695, %v2185_v14 }
0x145d   :  { %v2281_v16 = vrot.slane %v2276_v15, 2  ;;  %v3136_v34 = vpop.f32.mrb[23].mxu0 }
0x145f   :  { %v2283_v28 = vadd.f32 %v2281_v16, %v3624_v62 }
0x1461   :  { %3432 = vtanh.f32 %v2283_v28  ;;  %v2754_v36 = vmul.f32 -1.442695, %v2283_v28 }
0x1462   :  { %3434 = vpow2.f32 %v2752_v8 }
0x1463   :  { %3436 = vpow2.f32 %v2754_v36 }
0x1466   :  { %v3431_v17 = vpop.eup %3430 }
0x1467   :  { %2195 = vrot.lane.b32.xlu1 %v3431_v17, %s3514_s26 }
0x146b   :  { %v3433_v1 = vpop.eup %3432 }
0x146c   :  { %2296 = vrot.lane.b32.xlu0 %v3433_v1, %s3514_s26  ;;  %v3435_v19 = vpop.eup %3434 }
0x146d   :  { %v2189_v20 = vadd.f32 1.0, %v3435_v19  ;;  %v3437_v21 = vpop.eup %3436 }
0x146e   :  { %v2287_v22 = vadd.f32 1.0, %v3437_v21 }
0x146f   :  { %3438 = vrcp.f32 %v2189_v20 }
0x1470   :  { %3440 = vrcp.f32 %v2287_v22 }
0x1479   :  { %v3439_v23 = vpop.eup %3438 }
0x147a   :  { %v3441_v26 = vpop.eup %3440  ;;  %v2193_v32 = vmul.f32 %v3439_v23, %v3901_v59 }
0x147b   :  { %v2294_v29 = vmul.f32 %v3441_v26, %v2292_v35 }
0x14d9   :  { %v2196_v25 = vpop.permute.xlu1 %2195 }
0x14da   :  { %v2198_v62 = vmul.f32 %v3439_v23, %v2196_v25 }
0x14dc   :  { %2200 = vrot.lane.b32.xlu1 %v2198_v62, %s3515_s27 }
0x14de   :  { %v2297_v27 = vpop.permute.xlu0 %2296 }
0x14df   :  { %v2299_v31 = vmul.f32 %v3441_v26, %v2297_v27 }
0x14e1   :  { %2301 = vrot.lane.b32.xlu0 %v2299_v31, %s3515_s27 }
0x154e   :  { %v2201_v33 = vpop.permute.xlu1 %2200 }
0x154f   :  { %v2203_v37 = vadd.f32 %v2201_v33, %v2193_v32 }
0x1551   :  { %3442 = vtanh.f32 %v2203_v37 }
0x1553   :  { %v2302_v0 = vpop.permute.xlu0 %2301 }
0x1554   :  { %v2304_v38 = vadd.f32 %v2302_v0, %v2294_v29 }
0x1556   :  { %3444 = vtanh.f32 %v2304_v38 }
0x155b   :  { %v3443_v39 = vpop.eup %3442 }
0x155c   :  { %2206 = vrot.lane.b32.xlu1 %v3443_v39, %s3514_s26 }
0x1560   :  { %v3445_v40 = vpop.eup %3444 }
0x1561   :  { %2307 = vrot.lane.b32.xlu0 %v3445_v40, %s3514_s26 }
0x15ce   :  { %v2207_v41 = vpop.permute.xlu1 %2206 }
0x15cf   :  { %v2209_v43 = vmul.f32 %v3439_v23, %v2207_v41 }
0x15d1   :  { %2312 = vrot.lane.b32.xlu0 %v2209_v43, %s3515_s27 }
0x15d3   :  { %v2308_v44 = vpop.permute.xlu0 %2307 }
0x15d4   :  { %v2310_v45 = vmul.f32 %v3441_v26, %v2308_v44 }
0x15d6   :  { %v2387_v46 = vrot.slane %v2310_v45, 6  ;;  %v2487_v4 = vcombine.high %v2310_v45, %v2310_v45 }
0x15d8   :  { %2388 = vrot.lane.b32.xlu1 %v2387_v46, %s3515_s27  ;;  %v2494_v19 = vrot.slane %v2487_v4, %v3948_v6 }
0x15da   :  { %v2495_v21 = vcombine.high %v2494_v19, %v2494_v19  ;;  %v2502_v23 = vrot.slane %v2494_v19, %v3948_v6 }
0x15dc   :  { %v2509_v31 = vrot.slane %v2495_v21, %v3948_v6  ;;  %v2510_v33 = vcombine.high %v2502_v23, %v2502_v23 }
0x15de   :  { %v2511_v0 = vcombine.high %v2509_v31, %v2509_v31 }
0x1643   :  { %v2313_v47 = vpop.permute.xlu0 %2312 }
0x1644   :  { %3146 = vmatmul.mubr.msk.f32.vlgmr.msra.gmra.mrb[22].mxu1 %vm174_vm2, %v2313_v47 }
0x164a   :  { %v2389_v48 = vpop.permute.xlu1 %2388 }
0x164b   :  { %3157 = vmatmul.mubr.msk.f32.vlgmr.msra.gmra.mrb[24].mxu0 %vm174_vm2, %v2389_v48 }
0x1717   :  { %v2382_v49 = vpop.f32.mrb[22].mxu1 }
0x1718   :  { %v3147_v50 = vpop.f32.mrb[23].mxu1 }
0x171e   :  { %v2458_v51 = vpop.f32.mrb[24].mxu0 }
0x171f   :  { %v2459_v52 = vadd.f32 %v2458_v51, %v2382_v49  ;;  %v3158_v53 = vpop.f32.mrb[25].mxu0 }
0x1721   :  { %v2462_v54 = vadd.f32 %v3693_v42, %v2459_v52  ;;  %v2562_v42 = vcombine.high %v2304_v38, %v2304_v38 }
0x1723   :  { %3446 = vtanh.f32 %v2462_v54  ;;  %v2757_v56 = vmul.f32 -1.442695, %v2462_v54  ;;  %v2569_v7 = vrot.slane %v2562_v42, %v3948_v6 }
0x1725   :  { %3448 = vpow2.f32 %v2757_v56  ;;  %v2570_v10 = vcombine.high %v2569_v7, %v2569_v7  ;;  %v2577_v18 = vrot.slane %v2569_v7, %v3948_v6 }
0x1727   :  { %v2584_v14 = vrot.slane %v2570_v10, %v3948_v6  ;;  %v2585_v16 = vcombine.high %v2577_v18, %v2577_v18 }
0x1729   :  { %v2586_v17 = vcombine.high %v2584_v14, %v2584_v14 }
0x172d   :  { %v3447_v55 = vpop.eup %3446 }
0x172e   :  { %2472 = vrot.lane.b32.xlu0 %v3447_v55, %s3514_s26 }
0x172f   :  { %v3449_v57 = vpop.eup %3448 }
0x1730   :  { %v2466_v58 = vadd.f32 1.0, %v3449_v57 }
0x1732   :  { %3450 = vrcp.f32 %v2466_v58 }
0x173c   :  { %v3451_v59 = vpop.eup %3450 }
0x173d   :  { %v2470_v3 = vmul.f32 %v3451_v59, %v2203_v37 }
0x17a0   :  { %v2473_v60 = vpop.permute.xlu0 %2472 }
0x17a1   :  { %v2475_v61 = vmul.f32 %v3451_v59, %v2473_v60 }
0x17a3   :  { %2477 = vrot.lane.b32.xlu1 %v2475_v61, %s3515_s27 }
0x1815   :  { %v2478_v9 = vpop.permute.xlu1 %2477 }
0x1816   :  { %v2480_v11 = vadd.f32 %v2478_v9, %v2470_v3 }
0x1818   :  { %3452 = vtanh.f32 %v2480_v11  ;;  %v2596_v24 = vrot.slane %v2480_v11, %v3948_v6 }
0x181a   :  { %v2597_v12 = vcombine.high %v2596_v24, %v2596_v24  ;;  %v2604_v13 = vrot.slane %v2596_v24, %v3948_v6 }
0x181c   :  { %v2611_v15 = vrot.slane %v2597_v12, %v3948_v6  ;;  %v2615_v34 = vrot.slane %v2604_v13, %v2539_v30 }
0x181e   :  { %v2622_v28 = vsel %vm2547_vm3, %v2585_v16, %v2615_v34  ;;  %v2619_v1 = vrot.slane %v2611_v15, %v2539_v30 }
0x1820   :  { %v2623_v8 = vsel %vm2547_vm3, %v2586_v17, %v2619_v1 }
0x1822   :  { %v3453_v36 = vpop.eup %3452 }
0x1823   :  { %2483 = vrot.lane.b32.xlu0 %v3453_v36, %s3514_s26 }
0x1895   :  { %v2484_v20 = vpop.permute.xlu0 %2483 }
0x1896   :  { %v2486_v22 = vmul.f32 %v3451_v59, %v2484_v20 }
0x1898   :  { %v2521_v25 = vrot.slane %v2486_v22, %v3948_v6  ;;  %v2635_v62 = vmin.f32 %v2486_v22, 20.0  ;;  %vm2634_vm5 = vcmp.gt.f32.partialorder %v2486_v22, 20.0 }
0x189a   :  { %v2636_v26 = vmul.f32 1.442695, %v2635_v62  ;;  %v2529_v27 = vrot.slane %v2521_v25, %v3948_v6  ;;  %v2522_v32 = vcombine.high %v2521_v25, %v2521_v25 }
0x189c   :  { %3454 = vpow2.f32 %v2636_v26  ;;  %v2540_v37 = vrot.slane %v2529_v27, %v2539_v30  ;;  %v2536_v35 = vrot.slane %v2522_v32, %v3948_v6 }
0x189e   :  { %v2548_v29 = vsel %vm2547_vm3, %v2510_v33, %v2540_v37  ;;  %v2544_v38 = vrot.slane %v2536_v35, %v2539_v30 }
0x189f   :  { %2552 = vrot.lane.b32.xlu1 %v2548_v29, %s3515_s27 }
0x18a0   :  { %v2549_v39 = vsel %vm2547_vm3, %v2511_v0, %v2544_v38 }
0x18a1   :  { %2554 = vrot.lane.b32.xlu0 %v2549_v39, %s3515_s27 }
0x18a6   :  { %v3455_v40 = vpop.eup %3454 }
0x18a7   :  { %v2638_v41 = vadd.f32 1.0, %v3455_v40  ;;  %v2641_v43 = vmul.f32 -0.5, %v3455_v40  ;;  %v2644_v45 = vand.u32 2147483647, %v3455_v40 }
0x18a9   :  { %3456 = vlog2.f32 %v2638_v41  ;;  %v2642_v44 = vadd.f32 1.0, %v2641_v43  ;;  %vm2645_vm4 = vcmp.lt.f32.partialorder %v2644_v45, 0.0004427343 }
0x18ab   :  { %v2643_v48 = vmul.f32 %v3455_v40, %v2642_v44 }
0x18b3   :  { %v3457_v46 = vpop.eup %3456 }
0x18b4   :  { %v2640_v47 = vmul.f32 0.6931472, %v3457_v46 }
0x18b6   :  { %v2646_v49 = vsel %vm2645_vm4, %v2643_v48, %v2640_v47 }
0x18b7   :  { %v2647_v50 = vsel %vm2634_vm5, %v2486_v22, %v2646_v49 }
0x18b8   :  { %v2655_v51 = vrot.slane %v2647_v50, %v3948_v6 }
0x18ba   :  { %v2663_v52 = vrot.slane %v2655_v51, %v3948_v6  ;;  %v2656_v53 = vcombine.high %v2655_v51, %v2655_v51 }
0x18bc   :  { %v2674_v54 = vrot.slane %v2663_v52, %v2539_v30  ;;  %v2670_v55 = vrot.slane %v2656_v53, %v3948_v6 }
0x18be   :  { %2679 = vrot.lane.b32.xlu1 %v2674_v54, %s3515_s27  ;;  %v2678_v56 = vrot.slane %v2670_v55, %v2539_v30 }
0x18c0   :  { %2681 = vrot.lane.b32.xlu0 %v2678_v56, %s3515_s27 }
0x18c2   :  { %2626 = vrot.lane.b32.xlu1 %v2622_v28, %s3517_s2 }
0x18c4   :  { %2628 = vrot.lane.b32.xlu0 %v2623_v8, %s3517_s2 }
0x1911   :  { %v2553_v57 = vpop.permute.xlu1 %2552 }
0x1912   :  { %2559 = vst.msk [vmem:[%s4009_s6] sm:$0x3] %vm2558_vm6, %v2553_v57 }
0x1913   :  { %v2555_v58 = vpop.permute.xlu0 %2554 }
0x1914   :  { %2560 = vst.msk [vmem:[%s4009_s6 + $0x2] sm:$0x3] %vm2558_vm6, %v2555_v58 }
0x1930   :  { %v2680_v59 = vpop.permute.xlu1 %2679 }
0x1931   :  { %2686 = vst.msk [vmem:[#allocation5] sm:$0x1] %vm2685_vm7, %v2680_v59 }
0x1932   :  { %v2682_v60 = vpop.permute.xlu0 %2681 }
0x1933   :  { %2687 = vst.msk [vmem:[#allocation5 + $0x1] sm:$0x1] %vm2685_vm7, %v2682_v60 }
0x1934   :  { %v2627_v61 = vpop.permute.xlu1 %2626 }
0x1935   :  { %3491 = shalt.err (!%p3488_p12)
}
0x1936   :  { %s3492_s6 = scalar_lea.hbm %s4008_s5, 32 }
0x1937   :  { %p3493_p13 = scmp.ne.s32.totalorder %s4008_s5, %s3492_s6  ;;  %p3496_p0 = scmp.lt.u32.totalorder %s3492_s6, %s4008_s5 }
0x1939   :  { %p3498_p1 = pnand %p3496_p0, %p3493_p13 }
0x193b   :  { %3501 = shalt.err (!%p3498_p1)
}
0x193c   :  { %s3519_s18 = smov 16   ;;  %s3520_s19 = smov 1   ;;  %2632 = vst.msk [vmem:[%s4010_s7] sm:$0x3] %vm2558_vm6, %v2627_v61  ;;  %v2629_v63 = vpop.permute.xlu0 %2628 }
0x193d   :  { %2699 = dma.vmem_to_hbm [thread:$0]  %s2694_s11, 32, %s4008_s5, [#allocation4], %s3519_s18, %s3519_s18, %s3520_s19  }
0x193e   :  { %2633 = vst.msk [vmem:[%s4010_s7 + $0x2] sm:$0x3] %vm2558_vm6, %v2629_v63 }
0x193f   :  { %3504 = dma.done.wait [#allocation4], 32  }
0x1940   :  { %3505 = vsyncadd [#allocation4], 4294967264 }
0x1941   :  { %2711 = vsyncpa [#allocation3], 1 }
0x1942   :  { %2712 = vsyncpa [#allocation4], 1 }

</bundles_post_ra>
